<compile_context>
chip_gen: v7x
topology: tpu7x:2x2x1
jax: 0.10.0
libtpu: 0.0.40
codegen_flags: <defaults>
</compile_context>

<pallas_src>
import functools

import jax
import jax.numpy as jnp
from jax import lax
from jax.experimental import pallas as pl
from jax.experimental.pallas import tpu as pltpu


def _deca_kernel(x0_ref, x1_ref, w_ref, mask_ref, scale_ref, bias_ref,
                 fc1_ref, fc2_ref, out_vi_ref, out_ir_ref, *, h, w):
    # x0_ref, x1_ref : (1, C, HWp) f32   one batch element, spatially flattened (lane-padded)
    # w_ref          : (9, C, 2C)  bf16  3x3 conv taps over the concatenated [RGB, IR] channels
    # mask_ref       : (9, 1, HWp) bf16  per-tap halo masks (1 = keep), indexed by output column
    # scale/bias_ref : (C, 1)      f32   folded BatchNorm
    # fc1_ref        : (C, C//r)   f32   == torch fc1.weight.T
    # fc2_ref        : (C, C//r)   f32   == torch fc2.weight
    # out_*_ref      : (1, C, HWp) f32
    hw = h * w
    hwp = x0_ref.shape[2]
    inv_hw = 1.0 / float(hw)

    x0 = x0_ref[0]                                     # (C, HWp) f32
    x1 = x1_ref[0]

    # ---- SE branch: global average pool + 2-layer MLP + sigmoid (tiny, all f32) ----
    # Pad columns of x0/x1 are zero, so full-row sums divided by the true h*w are exact.
    pooled_vi = jnp.sum(x0, axis=1, keepdims=True) * inv_hw            # (C, 1)
    pooled_ir = jnp.sum(x1, axis=1, keepdims=True) * inv_hw

    def se(pooled):                                                    # (C,1) -> (C,1)
        hidden = jnp.sum(fc1_ref[...] * pooled, axis=0, keepdims=True)     # (1, C//r)
        hidden = jnp.maximum(hidden, 0.0)                                  # ReLU
        logits = jnp.sum(fc2_ref[...] * hidden, axis=1, keepdims=True)     # (C, 1)
        return 1.0 / (1.0 + jnp.exp(-logits))

    w_vi = se(pooled_vi)
    w_ir = se(pooled_ir)

    # ---- compress: 3x3 conv over cat([x0, x1], C) + folded BN + SiLU, on the MXU ----
    # One fused (C, 2C) @ (2C, HWp) dot per tap; bf16 operands, f32 accumulation.
    xcat = jnp.concatenate([x0, x1], axis=0)           # (2C, HWp) f32 (rolled in f32)
    xcat16 = xcat.astype(jnp.bfloat16)

    # Center tap (dy = dx = 0) is never masked -> use it to initialize the accumulator.
    acc = jnp.dot(w_ref[4], xcat16, preferred_element_type=jnp.float32)    # (C, HWp) f32
    for k in (0, 1, 2, 3, 5, 6, 7, 8):                 # remaining 8 taps, statically unrolled
        dy = k // 3 - 1
        dx = k % 3 - 1
        off = dy * w + dx
        # Want shifted[:, p] == xcat[:, (p + off) % HWp]  ==  np.roll(xcat, -off, axis=-1).
        shifted = pltpu.roll(xcat, (-off) % hwp, 1)    # XLU rotate; overlaps with MXU/VPU
        # Halo mask applied to the bf16 operand (per output column): zero the contribution of
        # source pixels that fall in the conv's zero-padding halo (or wrap around the roll).
        masked = shifted.astype(jnp.bfloat16) * mask_ref[k]
        acc = acc + jnp.dot(w_ref[k], masked, preferred_element_type=jnp.float32)

    y = acc * scale_ref[...] + bias_ref[...]           # folded BatchNorm
    y = y * pl.reciprocal(1.0 + jnp.exp(-y), approx=True)   # SiLU: exp + rcp both on the EUP

    # Spatial mean over the *valid* columns only (pad columns hold junk after bias/SiLU).
    if hwp != hw:
        col = lax.broadcasted_iota(jnp.int32, (1, hwp), 1)
        y_valid = jnp.where(col < hw, y, 0.0)
    else:
        y_valid = y
    glob = jnp.sum(y_valid, axis=1, keepdims=True) * inv_hw            # (C, 1)

    # ---- cross-modal gating ----
    gate_vi = 1.0 / (1.0 + jnp.exp(-(w_ir * glob)))    # IR channel weights gate the RGB stream
    gate_ir = 1.0 / (1.0 + jnp.exp(-(w_vi * glob)))    # RGB channel weights gate the IR stream
    out_vi_ref[0] = (x0 * gate_vi).astype(out_vi_ref.dtype)
    out_ir_ref[0] = (x1 * gate_ir).astype(out_ir_ref.dtype)


def _tap_masks(h, w, hwp):
    """Per-tap halo masks over output columns of the (lane-padded) flattened spatial axis."""
    col = jnp.arange(hwp, dtype=jnp.int32)
    row_i = col // w
    col_i = col % w
    masks = []
    for k in range(9):
        dy, dx = k // 3 - 1, k % 3 - 1
        m = jnp.ones((hwp,), jnp.bool_)
        if dy == -1:
            m = m & (row_i >= 1)
        elif dy == 1:
            m = m & (row_i <= h - 2)
        if dx == -1:
            m = m & (col_i >= 1)
        elif dx == 1:
            m = m & (col_i <= w - 2)
        masks.append(m)
    return jnp.stack(masks).astype(jnp.bfloat16).reshape(9, 1, hwp)


def deca_forward(x0, x1, params, *, kernel_size=80):
    """Pallas forward of DECA. x0 = RGB features, x1 = IR features, both NCHW."""
    b, c, h, w = x0.shape
    assert x1.shape == x0.shape
    if min(h, w) >= kernel_size:
        # TODO(synk): the depthwise conv-pyramid branch (only taken when min(h, w) >=
        # kernel_size) is left to plain XLA via the reference path; the Pallas kernel below
        # covers the common small-feature-map branch (glob = spatial mean).
        return deca_forward_ref(x0, x1, params, kernel_size=kernel_size)

    hw = h * w
    hwp = ((hw + 127) // 128) * 128                   # lane-dense flattened spatial axis
    cr = params["fc1_w"].shape[0]

    # Fold BatchNorm and lay the 3x3 conv weights out as 9 (C_out, 2C_in) MXU taps
    # (RGB and IR halves of the concatenated input fused into a single K=2C contraction).
    conv_w = params["conv_w"]                                         # (C, 2C, 3, 3) OIHW
    w_taps = jnp.transpose(conv_w, (2, 3, 0, 1)).reshape(9, c, 2 * c).astype(jnp.bfloat16)
    scale = params["bn_gamma"] / jnp.sqrt(params["bn_var"] + params["bn_eps"])
    bias = params["bn_beta"] - params["bn_mean"] * scale
    scale = scale.reshape(c, 1).astype(jnp.float32)
    bias = bias.reshape(c, 1).astype(jnp.float32)
    fc1_t = params["fc1_w"].T.astype(jnp.float32)                     # (C, C//r)
    fc2 = params["fc2_w"].astype(jnp.float32)                         # (C, C//r)
    masks = _tap_masks(h, w, hwp)                                     # (9, 1, HWp) bf16

    x0f = x0.reshape(b, c, hw)                                        # layout-free bitcast
    x1f = x1.reshape(b, c, hw)
    if hwp != hw:
        pad = ((0, 0), (0, 0), (0, hwp - hw))
        x0f = jnp.pad(x0f, pad)
        x1f = jnp.pad(x1f, pad)

    # VMEM budget from the block math: 4 activation blocks (double-buffered by the pipeline),
    # weights/masks (double-buffered), plus in-kernel temporaries (xcat/rolled/masked operand,
    # f32 acc and y).
    io_bytes = 4 * (c * hwp * 4) * 2
    wt_bytes = 2 * (9 * c * 2 * c * 2 + 9 * hwp * 2 + 2 * c * 4 + 2 * c * cr * 4)
    tmp_bytes = 3 * (2 * c * hwp * 4) + 3 * (c * hwp * 4)
    vmem_limit = int(min(128 * 1024 * 1024,
                         max(32 * 1024 * 1024, 1.5 * (io_bytes + wt_bytes + tmp_bytes))))

    kernel = functools.partial(_deca_kernel, h=h, w=w)
    out_vi, out_ir = pl.pallas_call(
        kernel,
        out_shape=(jax.ShapeDtypeStruct((b, c, hwp), x0.dtype),
                   jax.ShapeDtypeStruct((b, c, hwp), x1.dtype)),
        grid_spec=pltpu.PrefetchScalarGridSpec(
            num_scalar_prefetch=0,
            grid=(b,),
            # TODO(synk): for v7x-sized problems (C=512, 64 MiB VMEM) the grid-invariant weight
            # inputs should be single-buffered and the HW axis row-tiled into a two-pass
            # (conv/partial-sums, then gating) split; unnecessary at these block sizes.
            in_specs=[
                pl.BlockSpec((1, c, hwp), lambda i: (i, 0, 0)),       # x0 (one batch element)
                pl.BlockSpec((1, c, hwp), lambda i: (i, 0, 0)),       # x1
                pl.BlockSpec((9, c, 2 * c), lambda i: (0, 0, 0)),     # fused conv taps
                pl.BlockSpec((9, 1, hwp), lambda i: (0, 0, 0)),       # halo masks
                pl.BlockSpec((c, 1), lambda i: (0, 0)),               # folded BN scale
                pl.BlockSpec((c, 1), lambda i: (0, 0)),               # folded BN bias
                pl.BlockSpec((c, cr), lambda i: (0, 0)),              # fc1^T
                pl.BlockSpec((c, cr), lambda i: (0, 0)),              # fc2
            ],
            out_specs=(pl.BlockSpec((1, c, hwp), lambda i: (i, 0, 0)),
                       pl.BlockSpec((1, c, hwp), lambda i: (i, 0, 0))),
        ),
        compiler_params=pltpu.CompilerParams(
            dimension_semantics=("parallel",),
            vmem_limit_bytes=vmem_limit),
    )(x0f, x1f, w_taps, masks, scale, bias, fc1_t, fc2)

    out_vi = out_vi[:, :, :hw].reshape(b, c, h, w)
    out_ir = out_ir[:, :, :hw].reshape(b, c, h, w)
    return out_vi, out_ir


def deca_forward_ref(x0, x1, params, *, kernel_size=80):
    """Pure-JAX (XLA) reference of the DECA forward pass."""
    b, c, h, w = x0.shape

    def se(pooled):                                                   # (B, C) -> (B, C)
        hidden = jax.nn.relu(pooled @ params["fc1_w"].T)
        return jax.nn.sigmoid(hidden @ params["fc2_w"].T)

    w_vi = se(jnp.mean(x0, axis=(2, 3)))[:, :, None, None]
    w_ir = se(jnp.mean(x1, axis=(2, 3)))[:, :, None, None]

    xcat = jnp.concatenate([x0, x1], axis=1)
    glob_t = lax.conv_general_dilated(
        xcat, params["conv_w"], window_strides=(1, 1), padding=((1, 1), (1, 1)),
        dimension_numbers=("NCHW", "OIHW", "NCHW"))
    scale = params["bn_gamma"] / jnp.sqrt(params["bn_var"] + params["bn_eps"])
    bias = params["bn_beta"] - params["bn_mean"] * scale
    glob_t = glob_t * scale[None, :, None, None] + bias[None, :, None, None]
    glob_t = glob_t * jax.nn.sigmoid(glob_t)                          # SiLU

    if min(h, w) >= kernel_size:
        g = glob_t
        for wk, bk in params["pyramid"]:                              # depthwise conv pyramid
            k = wk.shape[-1]
            g = lax.conv_general_dilated(
                g, wk, window_strides=(k, k), padding="VALID",
                dimension_numbers=("NCHW", "OIHW", "NCHW"), feature_group_count=c)
            g = g + bk[None, :, None, None]
            g = g * jax.nn.sigmoid(g)
        glob = g
    else:
        glob = jnp.mean(glob_t, axis=(2, 3), keepdims=True)

    out_vi = x0 * jax.nn.sigmoid(w_ir * glob)
    out_ir = x1 * jax.nn.sigmoid(w_vi * glob)
    return out_vi, out_ir


def _make_pyramid_params(key, c, kernel_size, p_kernel=(5, 4)):
    """Depthwise conv-pyramid params (only used when min(h, w) >= kernel_size)."""
    k1, k2 = p_kernel
    k3 = int(kernel_size / k1 / k2)
    keys = jax.random.split(key, 6)
    out = []
    for i, k in enumerate((k1, k2, k3)):
        wk = 0.1 * jax.random.normal(keys[2 * i], (c, 1, k, k), jnp.float32)
        bk = 0.05 * jax.random.normal(keys[2 * i + 1], (c,), jnp.float32)
        out.append((wk, bk))
    return tuple(out)


if __name__ == "__main__":
    B, C = 2, 32
    REDUCTION = 16
    KERNEL_SIZE = 80                     # module default; min(H, W) < 80 -> spatial-mean glob

    key = jax.random.PRNGKey(0)
    k_cw, k_g, k_b, k_f1, k_f2, k_pyr, k_data = jax.random.split(key, 7)

    cr = C // REDUCTION
    params = {
        # compress = Conv2d(2C -> C, 3x3, s=1, p=1, bias=False) + BatchNorm2d + SiLU
        "conv_w": 0.05 * jax.random.normal(k_cw, (C, 2 * C, 3, 3), jnp.float32),
        "bn_gamma": 1.0 + 0.1 * jax.random.normal(k_g, (C,), jnp.float32),
        "bn_beta": 0.1 * jax.random.normal(k_b, (C,), jnp.float32),
        "bn_mean": jnp.zeros((C,), jnp.float32),
        "bn_var": jnp.ones((C,), jnp.float32),
        "bn_eps": 1e-3,
        # SE block: Linear(C, C//r, no bias) -> ReLU -> Linear(C//r, C, no bias) -> Sigmoid
        "fc1_w": 0.3 * jax.random.normal(k_f1, (cr, C), jnp.float32),
        "fc2_w": 0.3 * jax.random.normal(k_f2, (C, cr), jnp.float32),
        # depthwise conv pyramid (only used when min(H, W) >= KERNEL_SIZE; unused here)
        "pyramid": _make_pyramid_params(k_pyr, C, KERNEL_SIZE),
    }

    fwd = jax.jit(functools.partial(deca_forward, kernel_size=KERNEL_SIZE))

    # 16x16 (HW=256, lane-aligned) and 12x12 (HW=144, exercises the HW->128-multiple padding).
    for (H, W) in ((16, 16), (12, 12)):
        k_data, kx0, kx1 = jax.random.split(k_data, 3)
        x0 = jax.random.normal(kx0, (B, C, H, W), jnp.float32)
        x1 = jax.random.normal(kx1, (B, C, H, W), jnp.float32)

        out_vi, out_ir = fwd(x0, x1, params)
        jax.block_until_ready((out_vi, out_ir))

        ref_vi, ref_ir = deca_forward_ref(x0, x1, params, kernel_size=KERNEL_SIZE)
        assert out_vi.shape == x0.shape and out_ir.shape == x1.shape
        err = max(float(jnp.max(jnp.abs(out_vi - ref_vi))),
                  float(jnp.max(jnp.abs(out_ir - ref_ir))))
        # bf16 MXU operands + approx-reciprocal SiLU vs. a pure-f32 reference.
        assert err < 3e-2, f"max abs error vs f32 reference too large at {H}x{W}: {err}"

    print("KERNEL_OK")
</pallas_src>

<mosaic_0001>
module attributes {stable_mosaic.version = 11 : i64} {
  func.func @_deca_kernel(%arg0: i32, %arg1: memref<1x32x256xf32, #tpu.memory_space<vmem>>, %arg2: memref<1x32x256xf32, #tpu.memory_space<vmem>>, %arg3: memref<9x32x64xbf16, #tpu.memory_space<vmem>>, %arg4: memref<9x1x256xbf16, #tpu.memory_space<vmem>>, %arg5: memref<32x1xf32, #tpu.memory_space<vmem>>, %arg6: memref<32x1xf32, #tpu.memory_space<vmem>>, %arg7: memref<32x2xf32, #tpu.memory_space<vmem>>, %arg8: memref<32x2xf32, #tpu.memory_space<vmem>>, %arg9: memref<1x32x256xf32, #tpu.memory_space<vmem>>, %arg10: memref<1x32x256xf32, #tpu.memory_space<vmem>>) attributes {dimension_semantics = [#tpu.dimension_semantics<parallel>], iteration_bounds = array<i64: 2>, scalar_prefetch = 0 : i64, scratch_operands = 0 : i64, tpu.core_type = #tpu.core_type<tc>, window_params = [{transform_indices = @transform_0, window_bounds = array<i64: 1, 32, 256>}, {transform_indices = @transform_1, window_bounds = array<i64: 1, 32, 256>}, {pipeline_mode = #tpu.pipeline_mode<synchronous>, transform_indices = @transform_2, window_bounds = array<i64: 9, 32, 64>}, {pipeline_mode = #tpu.pipeline_mode<synchronous>, transform_indices = @transform_3, window_bounds = array<i64: 9, 1, 256>}, {pipeline_mode = #tpu.pipeline_mode<synchronous>, transform_indices = @transform_4, window_bounds = array<i64: 32, 1>}, {pipeline_mode = #tpu.pipeline_mode<synchronous>, transform_indices = @transform_5, window_bounds = array<i64: 32, 1>}, {pipeline_mode = #tpu.pipeline_mode<synchronous>, transform_indices = @transform_6, window_bounds = array<i64: 32, 2>}, {pipeline_mode = #tpu.pipeline_mode<synchronous>, transform_indices = @transform_7, window_bounds = array<i64: 32, 2>}, {transform_indices = @transform_8, window_bounds = array<i64: 1, 32, 256>}, {transform_indices = @transform_9, window_bounds = array<i64: 1, 32, 256>}]} {
    %c0 = arith.constant 0 : index
    %c0_0 = arith.constant 0 : index
    %c0_1 = arith.constant 0 : index
    %0 = vector.load %arg1[%c0, %c0_0, %c0_1] : memref<1x32x256xf32, #tpu.memory_space<vmem>>, vector<1x32x256xf32>
    %1 = vector.shape_cast %0 : vector<1x32x256xf32> to vector<32x256xf32>
    %c0_2 = arith.constant 0 : index
    %c0_3 = arith.constant 0 : index
    %c0_4 = arith.constant 0 : index
    %2 = vector.load %arg2[%c0_2, %c0_3, %c0_4] : memref<1x32x256xf32, #tpu.memory_space<vmem>>, vector<1x32x256xf32>
    %3 = vector.shape_cast %2 : vector<1x32x256xf32> to vector<32x256xf32>
    %cst = arith.constant dense<0.000000e+00> : vector<32xf32>
    %4 = vector.multi_reduction <add>, %1, %cst [1] : vector<32x256xf32> to vector<32xf32>
    %5 = vector.shape_cast %4 : vector<32xf32> to vector<32x1xf32>
    %cst_5 = arith.constant 3.906250e-03 : f32
    %6 = vector.broadcast %cst_5 : f32 to vector<32x1xf32>
    %7 = arith.mulf %5, %6 : vector<32x1xf32>
    %cst_6 = arith.constant dense<0.000000e+00> : vector<32xf32>
    %8 = vector.multi_reduction <add>, %3, %cst_6 [1] : vector<32x256xf32> to vector<32xf32>
    %9 = vector.shape_cast %8 : vector<32xf32> to vector<32x1xf32>
    %cst_7 = arith.constant 3.906250e-03 : f32
    %10 = vector.broadcast %cst_7 : f32 to vector<32x1xf32>
    %11 = arith.mulf %9, %10 : vector<32x1xf32>
    %c0_8 = arith.constant 0 : index
    %c0_9 = arith.constant 0 : index
    %12 = vector.load %arg7[%c0_8, %c0_9] : memref<32x2xf32, #tpu.memory_space<vmem>>, vector<32x2xf32>
    %13 = vector.broadcast %7 : vector<32x1xf32> to vector<32x2xf32>
    %14 = arith.mulf %12, %13 : vector<32x2xf32>
    %cst_10 = arith.constant dense<0.000000e+00> : vector<2xf32>
    %15 = vector.multi_reduction <add>, %14, %cst_10 [0] : vector<32x2xf32> to vector<2xf32>
    %16 = vector.shape_cast %15 : vector<2xf32> to vector<1x2xf32>
    %cst_11 = arith.constant 0.000000e+00 : f32
    %17 = vector.broadcast %cst_11 : f32 to vector<1x2xf32>
    %18 = arith.maximumf %16, %17 : vector<1x2xf32>
    %c0_12 = arith.constant 0 : index
    %c0_13 = arith.constant 0 : index
    %19 = vector.load %arg8[%c0_12, %c0_13] : memref<32x2xf32, #tpu.memory_space<vmem>>, vector<32x2xf32>
    %20 = vector.broadcast %18 : vector<1x2xf32> to vector<32x2xf32>
    %21 = arith.mulf %19, %20 : vector<32x2xf32>
    %cst_14 = arith.constant dense<0.000000e+00> : vector<32xf32>
    %22 = vector.multi_reduction <add>, %21, %cst_14 [1] : vector<32x2xf32> to vector<32xf32>
    %23 = vector.shape_cast %22 : vector<32xf32> to vector<32x1xf32>
    %cst_15 = arith.constant 0.000000e+00 : f32
    %24 = vector.broadcast %cst_15 : f32 to vector<32x1xf32>
    %25 = arith.subf %24, %23 : vector<32x1xf32>
    %26 = math.exp %25 : vector<32x1xf32>
    %cst_16 = arith.constant 1.000000e+00 : f32
    %27 = vector.broadcast %cst_16 : f32 to vector<32x1xf32>
    %28 = arith.addf %27, %26 : vector<32x1xf32>
    %cst_17 = arith.constant 1.000000e+00 : f32
    %29 = vector.broadcast %cst_17 : f32 to vector<32x1xf32>
    %30 = arith.divf %29, %28 : vector<32x1xf32>
    %c0_18 = arith.constant 0 : index
    %c0_19 = arith.constant 0 : index
    %31 = vector.load %arg7[%c0_18, %c0_19] : memref<32x2xf32, #tpu.memory_space<vmem>>, vector<32x2xf32>
    %32 = vector.broadcast %11 : vector<32x1xf32> to vector<32x2xf32>
    %33 = arith.mulf %31, %32 : vector<32x2xf32>
    %cst_20 = arith.constant dense<0.000000e+00> : vector<2xf32>
    %34 = vector.multi_reduction <add>, %33, %cst_20 [0] : vector<32x2xf32> to vector<2xf32>
    %35 = vector.shape_cast %34 : vector<2xf32> to vector<1x2xf32>
    %cst_21 = arith.constant 0.000000e+00 : f32
    %36 = vector.broadcast %cst_21 : f32 to vector<1x2xf32>
    %37 = arith.maximumf %35, %36 : vector<1x2xf32>
    %c0_22 = arith.constant 0 : index
    %c0_23 = arith.constant 0 : index
    %38 = vector.load %arg8[%c0_22, %c0_23] : memref<32x2xf32, #tpu.memory_space<vmem>>, vector<32x2xf32>
    %39 = vector.broadcast %37 : vector<1x2xf32> to vector<32x2xf32>
    %40 = arith.mulf %38, %39 : vector<32x2xf32>
    %cst_24 = arith.constant dense<0.000000e+00> : vector<32xf32>
    %41 = vector.multi_reduction <add>, %40, %cst_24 [1] : vector<32x2xf32> to vector<32xf32>
    %42 = vector.shape_cast %41 : vector<32xf32> to vector<32x1xf32>
    %cst_25 = arith.constant 0.000000e+00 : f32
    %43 = vector.broadcast %cst_25 : f32 to vector<32x1xf32>
    %44 = arith.subf %43, %42 : vector<32x1xf32>
    %45 = math.exp %44 : vector<32x1xf32>
    %cst_26 = arith.constant 1.000000e+00 : f32
    %46 = vector.broadcast %cst_26 : f32 to vector<32x1xf32>
    %47 = arith.addf %46, %45 : vector<32x1xf32>
    %cst_27 = arith.constant 1.000000e+00 : f32
    %48 = vector.broadcast %cst_27 : f32 to vector<32x1xf32>
    %49 = arith.divf %48, %47 : vector<32x1xf32>
    %50 = tpu.concatenate %1, %3 in 0 : vector<32x256xf32>, vector<32x256xf32> -> vector<64x256xf32>
    %51 = arith.truncf %50 : vector<64x256xf32> to vector<64x256xbf16>
    %c4 = arith.constant 4 : index
    %c0_28 = arith.constant 0 : index
    %c0_29 = arith.constant 0 : index
    %52 = vector.load %arg3[%c4, %c0_28, %c0_29] : memref<9x32x64xbf16, #tpu.memory_space<vmem>>, vector<1x32x64xbf16>
    %53 = vector.shape_cast %52 : vector<1x32x64xbf16> to vector<32x64xbf16>
    %cst_30 = arith.constant dense<0.000000e+00> : vector<32x256xf32>
    %54 = tpu.matmul %53, %51, %cst_30 {dimension_numbers = #tpu.dot_dimension_numbers<[1], [0], [0], [1], [0, 0, 1, 1], [], []>} : vector<32x64xbf16>, vector<64x256xbf16>, vector<32x256xf32> -> vector<32x256xf32>
    %c17_i32 = arith.constant 17 : i32
    %55 = tpu.dynamic_rotate %50 by %c17_i32 dim 1 : vector<64x256xf32>, i32 -> vector<64x256xf32>
    %56 = arith.truncf %55 : vector<64x256xf32> to vector<64x256xbf16>
    %c0_31 = arith.constant 0 : index
    %c0_32 = arith.constant 0 : index
    %c0_33 = arith.constant 0 : index
    %57 = vector.load %arg4[%c0_31, %c0_32, %c0_33] : memref<9x1x256xbf16, #tpu.memory_space<vmem>>, vector<1x1x256xbf16>
    %58 = vector.shape_cast %57 : vector<1x1x256xbf16> to vector<1x256xbf16>
    %59 = vector.broadcast %58 : vector<1x256xbf16> to vector<64x256xbf16>
    %60 = arith.mulf %56, %59 : vector<64x256xbf16>
    %c0_34 = arith.constant 0 : index
    %c0_35 = arith.constant 0 : index
    %c0_36 = arith.constant 0 : index
    %61 = vector.load %arg3[%c0_34, %c0_35, %c0_36] : memref<9x32x64xbf16, #tpu.memory_space<vmem>>, vector<1x32x64xbf16>
    %62 = vector.shape_cast %61 : vector<1x32x64xbf16> to vector<32x64xbf16>
    %cst_37 = arith.constant dense<0.000000e+00> : vector<32x256xf32>
    %63 = tpu.matmul %62, %60, %cst_37 {dimension_numbers = #tpu.dot_dimension_numbers<[1], [0], [0], [1], [0, 0, 1, 1], [], []>} : vector<32x64xbf16>, vector<64x256xbf16>, vector<32x256xf32> -> vector<32x256xf32>
    %64 = arith.addf %54, %63 : vector<32x256xf32>
    %c16_i32 = arith.constant 16 : i32
    %65 = tpu.dynamic_rotate %50 by %c16_i32 dim 1 : vector<64x256xf32>, i32 -> vector<64x256xf32>
    %66 = arith.truncf %65 : vector<64x256xf32> to vector<64x256xbf16>
    %c1 = arith.constant 1 : index
    %c0_38 = arith.constant 0 : index
    %c0_39 = arith.constant 0 : index
    %67 = vector.load %arg4[%c1, %c0_38, %c0_39] : memref<9x1x256xbf16, #tpu.memory_space<vmem>>, vector<1x1x256xbf16>
    %68 = vector.shape_cast %67 : vector<1x1x256xbf16> to vector<1x256xbf16>
    %69 = vector.broadcast %68 : vector<1x256xbf16> to vector<64x256xbf16>
    %70 = arith.mulf %66, %69 : vector<64x256xbf16>
    %c1_40 = arith.constant 1 : index
    %c0_41 = arith.constant 0 : index
    %c0_42 = arith.constant 0 : index
    %71 = vector.load %arg3[%c1_40, %c0_41, %c0_42] : memref<9x32x64xbf16, #tpu.memory_space<vmem>>, vector<1x32x64xbf16>
    %72 = vector.shape_cast %71 : vector<1x32x64xbf16> to vector<32x64xbf16>
    %cst_43 = arith.constant dense<0.000000e+00> : vector<32x256xf32>
    %73 = tpu.matmul %72, %70, %cst_43 {dimension_numbers = #tpu.dot_dimension_numbers<[1], [0], [0], [1], [0, 0, 1, 1], [], []>} : vector<32x64xbf16>, vector<64x256xbf16>, vector<32x256xf32> -> vector<32x256xf32>
    %74 = arith.addf %64, %73 : vector<32x256xf32>
    %c15_i32 = arith.constant 15 : i32
    %75 = tpu.dynamic_rotate %50 by %c15_i32 dim 1 : vector<64x256xf32>, i32 -> vector<64x256xf32>
    %76 = arith.truncf %75 : vector<64x256xf32> to vector<64x256xbf16>
    %c2 = arith.constant 2 : index
    %c0_44 = arith.constant 0 : index
    %c0_45 = arith.constant 0 : index
    %77 = vector.load %arg4[%c2, %c0_44, %c0_45] : memref<9x1x256xbf16, #tpu.memory_space<vmem>>, vector<1x1x256xbf16>
    %78 = vector.shape_cast %77 : vector<1x1x256xbf16> to vector<1x256xbf16>
    %79 = vector.broadcast %78 : vector<1x256xbf16> to vector<64x256xbf16>
    %80 = arith.mulf %76, %79 : vector<64x256xbf16>
    %c2_46 = arith.constant 2 : index
    %c0_47 = arith.constant 0 : index
    %c0_48 = arith.constant 0 : index
    %81 = vector.load %arg3[%c2_46, %c0_47, %c0_48] : memref<9x32x64xbf16, #tpu.memory_space<vmem>>, vector<1x32x64xbf16>
    %82 = vector.shape_cast %81 : vector<1x32x64xbf16> to vector<32x64xbf16>
    %cst_49 = arith.constant dense<0.000000e+00> : vector<32x256xf32>
    %83 = tpu.matmul %82, %80, %cst_49 {dimension_numbers = #tpu.dot_dimension_numbers<[1], [0], [0], [1], [0, 0, 1, 1], [], []>} : vector<32x64xbf16>, vector<64x256xbf16>, vector<32x256xf32> -> vector<32x256xf32>
    %84 = arith.addf %74, %83 : vector<32x256xf32>
    %c1_i32 = arith.constant 1 : i32
    %85 = tpu.dynamic_rotate %50 by %c1_i32 dim 1 : vector<64x256xf32>, i32 -> vector<64x256xf32>
    %86 = arith.truncf %85 : vector<64x256xf32> to vector<64x256xbf16>
    %c3 = arith.constant 3 : index
    %c0_50 = arith.constant 0 : index
    %c0_51 = arith.constant 0 : index
    %87 = vector.load %arg4[%c3, %c0_50, %c0_51] : memref<9x1x256xbf16, #tpu.memory_space<vmem>>, vector<1x1x256xbf16>
    %88 = vector.shape_cast %87 : vector<1x1x256xbf16> to vector<1x256xbf16>
    %89 = vector.broadcast %88 : vector<1x256xbf16> to vector<64x256xbf16>
    %90 = arith.mulf %86, %89 : vector<64x256xbf16>
    %c3_52 = arith.constant 3 : index
    %c0_53 = arith.constant 0 : index
    %c0_54 = arith.constant 0 : index
    %91 = vector.load %arg3[%c3_52, %c0_53, %c0_54] : memref<9x32x64xbf16, #tpu.memory_space<vmem>>, vector<1x32x64xbf16>
    %92 = vector.shape_cast %91 : vector<1x32x64xbf16> to vector<32x64xbf16>
    %cst_55 = arith.constant dense<0.000000e+00> : vector<32x256xf32>
    %93 = tpu.matmul %92, %90, %cst_55 {dimension_numbers = #tpu.dot_dimension_numbers<[1], [0], [0], [1], [0, 0, 1, 1], [], []>} : vector<32x64xbf16>, vector<64x256xbf16>, vector<32x256xf32> -> vector<32x256xf32>
    %94 = arith.addf %84, %93 : vector<32x256xf32>
    %c255_i32 = arith.constant 255 : i32
    %95 = tpu.dynamic_rotate %50 by %c255_i32 dim 1 : vector<64x256xf32>, i32 -> vector<64x256xf32>
    %96 = arith.truncf %95 : vector<64x256xf32> to vector<64x256xbf16>
    %c5 = arith.constant 5 : index
    %c0_56 = arith.constant 0 : index
    %c0_57 = arith.constant 0 : index
    %97 = vector.load %arg4[%c5, %c0_56, %c0_57] : memref<9x1x256xbf16, #tpu.memory_space<vmem>>, vector<1x1x256xbf16>
    %98 = vector.shape_cast %97 : vector<1x1x256xbf16> to vector<1x256xbf16>
    %99 = vector.broadcast %98 : vector<1x256xbf16> to vector<64x256xbf16>
    %100 = arith.mulf %96, %99 : vector<64x256xbf16>
    %c5_58 = arith.constant 5 : index
    %c0_59 = arith.constant 0 : index
    %c0_60 = arith.constant 0 : index
    %101 = vector.load %arg3[%c5_58, %c0_59, %c0_60] : memref<9x32x64xbf16, #tpu.memory_space<vmem>>, vector<1x32x64xbf16>
    %102 = vector.shape_cast %101 : vector<1x32x64xbf16> to vector<32x64xbf16>
    %cst_61 = arith.constant dense<0.000000e+00> : vector<32x256xf32>
    %103 = tpu.matmul %102, %100, %cst_61 {dimension_numbers = #tpu.dot_dimension_numbers<[1], [0], [0], [1], [0, 0, 1, 1], [], []>} : vector<32x64xbf16>, vector<64x256xbf16>, vector<32x256xf32> -> vector<32x256xf32>
    %104 = arith.addf %94, %103 : vector<32x256xf32>
    %c241_i32 = arith.constant 241 : i32
    %105 = tpu.dynamic_rotate %50 by %c241_i32 dim 1 : vector<64x256xf32>, i32 -> vector<64x256xf32>
    %106 = arith.truncf %105 : vector<64x256xf32> to vector<64x256xbf16>
    %c6 = arith.constant 6 : index
    %c0_62 = arith.constant 0 : index
    %c0_63 = arith.constant 0 : index
    %107 = vector.load %arg4[%c6, %c0_62, %c0_63] : memref<9x1x256xbf16, #tpu.memory_space<vmem>>, vector<1x1x256xbf16>
    %108 = vector.shape_cast %107 : vector<1x1x256xbf16> to vector<1x256xbf16>
    %109 = vector.broadcast %108 : vector<1x256xbf16> to vector<64x256xbf16>
    %110 = arith.mulf %106, %109 : vector<64x256xbf16>
    %c6_64 = arith.constant 6 : index
    %c0_65 = arith.constant 0 : index
    %c0_66 = arith.constant 0 : index
    %111 = vector.load %arg3[%c6_64, %c0_65, %c0_66] : memref<9x32x64xbf16, #tpu.memory_space<vmem>>, vector<1x32x64xbf16>
    %112 = vector.shape_cast %111 : vector<1x32x64xbf16> to vector<32x64xbf16>
    %cst_67 = arith.constant dense<0.000000e+00> : vector<32x256xf32>
    %113 = tpu.matmul %112, %110, %cst_67 {dimension_numbers = #tpu.dot_dimension_numbers<[1], [0], [0], [1], [0, 0, 1, 1], [], []>} : vector<32x64xbf16>, vector<64x256xbf16>, vector<32x256xf32> -> vector<32x256xf32>
    %114 = arith.addf %104, %113 : vector<32x256xf32>
    %c240_i32 = arith.constant 240 : i32
    %115 = tpu.dynamic_rotate %50 by %c240_i32 dim 1 : vector<64x256xf32>, i32 -> vector<64x256xf32>
    %116 = arith.truncf %115 : vector<64x256xf32> to vector<64x256xbf16>
    %c7 = arith.constant 7 : index
    %c0_68 = arith.constant 0 : index
    %c0_69 = arith.constant 0 : index
    %117 = vector.load %arg4[%c7, %c0_68, %c0_69] : memref<9x1x256xbf16, #tpu.memory_space<vmem>>, vector<1x1x256xbf16>
    %118 = vector.shape_cast %117 : vector<1x1x256xbf16> to vector<1x256xbf16>
    %119 = vector.broadcast %118 : vector<1x256xbf16> to vector<64x256xbf16>
    %120 = arith.mulf %116, %119 : vector<64x256xbf16>
    %c7_70 = arith.constant 7 : index
    %c0_71 = arith.constant 0 : index
    %c0_72 = arith.constant 0 : index
    %121 = vector.load %arg3[%c7_70, %c0_71, %c0_72] : memref<9x32x64xbf16, #tpu.memory_space<vmem>>, vector<1x32x64xbf16>
    %122 = vector.shape_cast %121 : vector<1x32x64xbf16> to vector<32x64xbf16>
    %cst_73 = arith.constant dense<0.000000e+00> : vector<32x256xf32>
    %123 = tpu.matmul %122, %120, %cst_73 {dimension_numbers = #tpu.dot_dimension_numbers<[1], [0], [0], [1], [0, 0, 1, 1], [], []>} : vector<32x64xbf16>, vector<64x256xbf16>, vector<32x256xf32> -> vector<32x256xf32>
    %124 = arith.addf %114, %123 : vector<32x256xf32>
    %c239_i32 = arith.constant 239 : i32
    %125 = tpu.dynamic_rotate %50 by %c239_i32 dim 1 : vector<64x256xf32>, i32 -> vector<64x256xf32>
    %126 = arith.truncf %125 : vector<64x256xf32> to vector<64x256xbf16>
    %c8 = arith.constant 8 : index
    %c0_74 = arith.constant 0 : index
    %c0_75 = arith.constant 0 : index
    %127 = vector.load %arg4[%c8, %c0_74, %c0_75] : memref<9x1x256xbf16, #tpu.memory_space<vmem>>, vector<1x1x256xbf16>
    %128 = vector.shape_cast %127 : vector<1x1x256xbf16> to vector<1x256xbf16>
    %129 = vector.broadcast %128 : vector<1x256xbf16> to vector<64x256xbf16>
    %130 = arith.mulf %126, %129 : vector<64x256xbf16>
    %c8_76 = arith.constant 8 : index
    %c0_77 = arith.constant 0 : index
    %c0_78 = arith.constant 0 : index
    %131 = vector.load %arg3[%c8_76, %c0_77, %c0_78] : memref<9x32x64xbf16, #tpu.memory_space<vmem>>, vector<1x32x64xbf16>
    %132 = vector.shape_cast %131 : vector<1x32x64xbf16> to vector<32x64xbf16>
    %cst_79 = arith.constant dense<0.000000e+00> : vector<32x256xf32>
    %133 = tpu.matmul %132, %130, %cst_79 {dimension_numbers = #tpu.dot_dimension_numbers<[1], [0], [0], [1], [0, 0, 1, 1], [], []>} : vector<32x64xbf16>, vector<64x256xbf16>, vector<32x256xf32> -> vector<32x256xf32>
    %134 = arith.addf %124, %133 : vector<32x256xf32>
    %c0_80 = arith.constant 0 : index
    %c0_81 = arith.constant 0 : index
    %135 = vector.load %arg5[%c0_80, %c0_81] : memref<32x1xf32, #tpu.memory_space<vmem>>, vector<32x1xf32>
    %136 = vector.broadcast %135 : vector<32x1xf32> to vector<32x256xf32>
    %137 = arith.mulf %134, %136 : vector<32x256xf32>
    %c0_82 = arith.constant 0 : index
    %c0_83 = arith.constant 0 : index
    %138 = vector.load %arg6[%c0_82, %c0_83] : memref<32x1xf32, #tpu.memory_space<vmem>>, vector<32x1xf32>
    %139 = vector.broadcast %138 : vector<32x1xf32> to vector<32x256xf32>
    %140 = arith.addf %137, %139 : vector<32x256xf32>
    %cst_84 = arith.constant 0.000000e+00 : f32
    %141 = vector.broadcast %cst_84 : f32 to vector<32x256xf32>
    %142 = arith.subf %141, %140 : vector<32x256xf32>
    %143 = math.exp %142 : vector<32x256xf32>
    %cst_85 = arith.constant 1.000000e+00 : f32
    %144 = vector.broadcast %cst_85 : f32 to vector<32x256xf32>
    %145 = arith.addf %144, %143 : vector<32x256xf32>
    %146 = tpu.reciprocal %145 {approx = true} : vector<32x256xf32> -> vector<32x256xf32>
    %147 = arith.mulf %140, %146 : vector<32x256xf32>
    %cst_86 = arith.constant dense<0.000000e+00> : vector<32xf32>
    %148 = vector.multi_reduction <add>, %147, %cst_86 [1] : vector<32x256xf32> to vector<32xf32>
    %149 = vector.shape_cast %148 : vector<32xf32> to vector<32x1xf32>
    %cst_87 = arith.constant 3.906250e-03 : f32
    %150 = vector.broadcast %cst_87 : f32 to vector<32x1xf32>
    %151 = arith.mulf %149, %150 : vector<32x1xf32>
    %152 = arith.mulf %49, %151 : vector<32x1xf32>
    %cst_88 = arith.constant 0.000000e+00 : f32
    %153 = vector.broadcast %cst_88 : f32 to vector<32x1xf32>
    %154 = arith.subf %153, %152 : vector<32x1xf32>
    %155 = math.exp %154 : vector<32x1xf32>
    %cst_89 = arith.constant 1.000000e+00 : f32
    %156 = vector.broadcast %cst_89 : f32 to vector<32x1xf32>
    %157 = arith.addf %156, %155 : vector<32x1xf32>
    %cst_90 = arith.constant 1.000000e+00 : f32
    %158 = vector.broadcast %cst_90 : f32 to vector<32x1xf32>
    %159 = arith.divf %158, %157 : vector<32x1xf32>
    %160 = arith.mulf %30, %151 : vector<32x1xf32>
    %cst_91 = arith.constant 0.000000e+00 : f32
    %161 = vector.broadcast %cst_91 : f32 to vector<32x1xf32>
    %162 = arith.subf %161, %160 : vector<32x1xf32>
    %163 = math.exp %162 : vector<32x1xf32>
    %cst_92 = arith.constant 1.000000e+00 : f32
    %164 = vector.broadcast %cst_92 : f32 to vector<32x1xf32>
    %165 = arith.addf %164, %163 : vector<32x1xf32>
    %cst_93 = arith.constant 1.000000e+00 : f32
    %166 = vector.broadcast %cst_93 : f32 to vector<32x1xf32>
    %167 = arith.divf %166, %165 : vector<32x1xf32>
    %168 = vector.broadcast %159 : vector<32x1xf32> to vector<32x256xf32>
    %169 = arith.mulf %1, %168 : vector<32x256xf32>
    %c0_94 = arith.constant 0 : index
    %c0_95 = arith.constant 0 : index
    %c0_96 = arith.constant 0 : index
    %170 = vector.load %arg9[%c0_94, %c0_95, %c0_96] : memref<1x32x256xf32, #tpu.memory_space<vmem>>, vector<1x32x256xf32>
    %171 = vector.shape_cast %170 : vector<1x32x256xf32> to vector<32x256xf32>
    %172 = vector.shape_cast %169 : vector<32x256xf32> to vector<1x32x256xf32>
    tpu.vector_store %arg9[%c0_94, %c0_95, %c0_96], %172 {strides = array<i32>} : memref<1x32x256xf32, #tpu.memory_space<vmem>>, vector<1x32x256xf32>,
    %173 = vector.broadcast %167 : vector<32x1xf32> to vector<32x256xf32>
    %174 = arith.mulf %3, %173 : vector<32x256xf32>
    %c0_97 = arith.constant 0 : index
    %c0_98 = arith.constant 0 : index
    %c0_99 = arith.constant 0 : index
    %175 = vector.load %arg10[%c0_97, %c0_98, %c0_99] : memref<1x32x256xf32, #tpu.memory_space<vmem>>, vector<1x32x256xf32>
    %176 = vector.shape_cast %175 : vector<1x32x256xf32> to vector<32x256xf32>
    %177 = vector.shape_cast %174 : vector<32x256xf32> to vector<1x32x256xf32>
    tpu.vector_store %arg10[%c0_97, %c0_98, %c0_99], %177 {strides = array<i32>} : memref<1x32x256xf32, #tpu.memory_space<vmem>>, vector<1x32x256xf32>,
    return
  }
  func.func @transform_0(%arg0: i32) -> (i32, i32, i32) {
    %c0_i32 = arith.constant 0 : i32
    %c0_i32_0 = arith.constant 0 : i32
    %c0_i32_1 = arith.constant 0 : i32
    return %arg0, %c0_i32, %c0_i32_0 : i32, i32, i32
  }
  func.func @transform_1(%arg0: i32) -> (i32, i32, i32) {
    %c0_i32 = arith.constant 0 : i32
    %c0_i32_0 = arith.constant 0 : i32
    %c0_i32_1 = arith.constant 0 : i32
    return %arg0, %c0_i32, %c0_i32_0 : i32, i32, i32
  }
  func.func @transform_2(%arg0: i32) -> (i32, i32, i32) {
    %c0_i32 = arith.constant 0 : i32
    %c0_i32_0 = arith.constant 0 : i32
    %c0_i32_1 = arith.constant 0 : i32
    %c0_i32_2 = arith.constant 0 : i32
    return %c0_i32, %c0_i32_0, %c0_i32_1 : i32, i32, i32
  }
  func.func @transform_3(%arg0: i32) -> (i32, i32, i32) {
    %c0_i32 = arith.constant 0 : i32
    %c0_i32_0 = arith.constant 0 : i32
    %c0_i32_1 = arith.constant 0 : i32
    %c0_i32_2 = arith.constant 0 : i32
    return %c0_i32, %c0_i32_0, %c0_i32_1 : i32, i32, i32
  }
  func.func @transform_4(%arg0: i32) -> (i32, i32) {
    %c0_i32 = arith.constant 0 : i32
    %c0_i32_0 = arith.constant 0 : i32
    %c0_i32_1 = arith.constant 0 : i32
    return %c0_i32, %c0_i32_0 : i32, i32
  }
  func.func @transform_5(%arg0: i32) -> (i32, i32) {
    %c0_i32 = arith.constant 0 : i32
    %c0_i32_0 = arith.constant 0 : i32
    %c0_i32_1 = arith.constant 0 : i32
    return %c0_i32, %c0_i32_0 : i32, i32
  }
  func.func @transform_6(%arg0: i32) -> (i32, i32) {
    %c0_i32 = arith.constant 0 : i32
    %c0_i32_0 = arith.constant 0 : i32
    %c0_i32_1 = arith.constant 0 : i32
    return %c0_i32, %c0_i32_0 : i32, i32
  }
  func.func @transform_7(%arg0: i32) -> (i32, i32) {
    %c0_i32 = arith.constant 0 : i32
    %c0_i32_0 = arith.constant 0 : i32
    %c0_i32_1 = arith.constant 0 : i32
    return %c0_i32, %c0_i32_0 : i32, i32
  }
  func.func @transform_8(%arg0: i32) -> (i32, i32, i32) {
    %c0_i32 = arith.constant 0 : i32
    %c0_i32_0 = arith.constant 0 : i32
    %c0_i32_1 = arith.constant 0 : i32
    return %arg0, %c0_i32, %c0_i32_0 : i32, i32, i32
  }
  func.func @transform_9(%arg0: i32) -> (i32, i32, i32) {
    %c0_i32 = arith.constant 0 : i32
    %c0_i32_0 = arith.constant 0 : i32
    %c0_i32_1 = arith.constant 0 : i32
    return %arg0, %c0_i32, %c0_i32_0 : i32, i32, i32
  }
}

</mosaic_0001>

<bundles_post_ra>
// kernel: deca_forward.1
= control target key start
LH: loop header
LB: loop body
LE: loop exit
PB: predicated region body
PF: predicated region fallthrough
CT: control target
= control target key end

     0   :  { %s3131_s30 = smov 0   ;;  %s4040_s0 = inlined_call_operand.vmem [shape: f32[2,32,256], index: 0, kind: input, shape index: {}]   ;;  %s4041_s1 = inlined_call_operand.vmem [shape: f32[2,32,256], index: 1, kind: input, shape index: {}]   ;;  %s4042_s2 = inlined_call_operand.vmem [shape: bf16[9,32,64], index: 2, kind: input, shape index: {}]   ;;  %s4043_s3 = inlined_call_operand.vmem [shape: bf16[9,1,256], index: 3, kind: input, shape index: {}]   ;;  %s4044_s4 = inlined_call_operand.vmem [shape: f32[32,1], index: 4, kind: input, shape index: {}]   ;;  %s4045_s5 = inlined_call_operand.vmem [shape: f32[32,1], index: 5, kind: input, shape index: {}]   ;;  %s4046_s6 = inlined_call_operand.vmem [shape: f32[32,2], index: 6, kind: input, shape index: {}]   ;;  %s4047_s7 = inlined_call_operand.vmem [shape: f32[32,2], index: 7, kind: input, shape index: {}]   ;;  %s4048_s8 = inlined_call_operand.vmem [shape: f32[2,32,256], index: 8, kind: output, shape index: {0}]   ;;  %s4049_s9 = inlined_call_operand.vmem [shape: f32[2,32,256], index: 9, kind: output, shape index: {1}]  }
   0x1 LB: > { %s2419_s10 = sadd.s32 4294967295, %s3069_s30   ;;  %p2423_p0 = scmp.ge.s32.totalorder %s3069_s30, 1  ;;  %s3069_s30 = sphi %s3131_s30, %s20_s30  }
   0x2   : > { %p300_p1 = scmp.lt.s32.totalorder %s3069_s30, 3 }
   0x4   : > { %p301_p2 = pnand %p2423_p0, %p300_p1 }
   0x5   : > { %p346_p3 = scmp.lt.s32.totalorder (!%p301_p2), %s2419_s10, 1  ;;  %s3071_s15 = smov (!%p301_p2), 1   ;;  %v3073_v24 = vmov (!%p301_p2), 0   ;;  %v585_v25 = vlaneseq (!%p301_p2)  ;;  %v3079_v26 = vmov (!%p301_p2), 1966171168   ;;  %vm672_vm3 = vcmask (!%p301_p2), 523264  }
   0x6   : > { %304 = sbr.rel (%p301_p2) target bundleno = 708 (0x2c4), region = 52  ;;  %s3072_s16 = smov (!%p301_p2), 17   ;;  %711 = vmatprep.mubr.bf16.mxu1 (!%p301_p2), %v3073_v24  ;;  %1330 = vmatprep.mubr.bf16.mxu0 (!%p301_p2), %v3073_v24  ;;  %v623_v27 = vunpack.c.l.s4 (!%p301_p2), %v3079_v26  ;;  %v2466_v30 = vld.sshfl [vmem:[%s4043_s3 + $0x6] sm:$0x11 pattern:$0x75316420] (!%p301_p2) }
   0x7   : > { %2931 = vset.pattern.permute.xlu1 (!%p301_p2), %v3073_v24  ;;  %2932 = vset.pattern.permute.xlu0 (!%p301_p2), %v3073_v24  ;;  %s3074_s20 = smov (!%p301_p2), 127   ;;  %s3075_s21 = smov (!%p301_p2), 16   ;;  %v626_v29 = vshrl.u32 (!%p301_p2), %v585_v25, 7  ;;  %v1240_v33 = vcombine.high (!%p301_p2), %v2466_v30, %v2466_v30  ;;  %v3324_v41 = vand.u32 (!%p301_p2), 127, %v585_v25  ;;  %vm423_vm9 = vcmask (!%p301_p2), 15360  }
   0x8   : > { %s3076_s22 = smov (!%p301_p2), 113   ;;  %s3077_s23 = smov (!%p301_p2), 15   ;;  %v624_v28 = vunpack.c.0.s8 (!%p301_p2), %v623_v27  ;;  %v2436_v31 = vld.sshfl [vmem:[%s4043_s3] sm:$0x11 pattern:$0x75316420] (!%p301_p2) }
   0x9   : > { %s3078_s24 = smov (!%p301_p2), 112   ;;  %v621_v34 = vcombine.high (!%p301_p2), %v2436_v31, %v2436_v31  ;;  %v2476_v35 = vld.sshfl [vmem:[%s4043_s3 + $0xa] sm:$0x11 pattern:$0x75316420] (!%p301_p2)  ;;  %s3080_s12 = smov (!%p301_p2), 111  }
   0xa   : > { %v3313_v32 = vsub.s32 (!%p301_p2), %v624_v28, %v626_v29  ;;  %v1426_v36 = vcombine.high (!%p301_p2), %v2476_v35, %v2476_v35  ;;  %v3330_v42 = vsub.s32 (!%p301_p2), 0, %v626_v29  ;;  %vm587_vm0 = vcmp.lt.s32.totalorder (!%p301_p2), %v3324_v41, 17 }
   0xb   : > { %vm1205_vm1 = vcmp.lt.s32.totalorder (!%p301_p2), %v3324_v41, 1  ;;  %vm1391_vm2 = vcmp.lt.s32.totalorder (!%p301_p2), %v3324_v41, 127  ;;  %vm833_vm4 = vcmp.lt.s32.totalorder (!%p301_p2), %v3324_v41, 16  ;;  %vm1577_vm5 = vcmp.lt.s32.totalorder (!%p301_p2), %v3324_v41, 113 }
   0xc   : > { %v1254_v37 = vrot.slane (!%p301_p2), %v1240_v33, %v3313_v32  ;;  %v635_v38 = vrot.slane (!%p301_p2), %v621_v34, %v3313_v32  ;;  %v628_v39 = vrot.slane (!%p301_p2), %v2436_v31, %v3313_v32  ;;  %v1247_v40 = vrot.slane (!%p301_p2), %v2466_v30, %v3313_v32 }
   0xd   : > { %s4051_s10 = smov (!%p346_p3, %s2419_s10), 1  ;;  %v1440_v43 = vrot.slane %v1426_v36, %v3313_v32  ;;  %v1433_v44 = vrot.slane %v2476_v35, %v3313_v32  ;;  %vm1019_vm6 = vcmp.lt.s32.totalorder %v3324_v41, 15  ;;  %vm1763_vm7 = vcmp.lt.s32.totalorder %v3324_v41, 112 }
   0xe   : > { %s3139_s11 = sshll.u32 %s4051_s10, 6  ;;  %v1263_v45 = vpack.i.b16 %v1254_v37, %v1254_v37  ;;  %v644_v46 = vpack.i.b16 %v635_v38, %v635_v38  ;;  %v637_v47 = vpack.i.b16 %v628_v39, %v628_v39  ;;  %v1256_v48 = vpack.i.b16 %v1247_v40, %v1247_v40 }
   0xf   : > { %s3145_s14 = scalar_lea.vmem %s4040_s0, %s3139_s11  ;;  %s3199_s19 = scalar_lea.vmem %s4041_s1, %s3139_s11  ;;  %v1449_v51 = vpack.i.b16 %v1440_v43, %v1440_v43  ;;  %v1442_v52 = vpack.i.b16 %v1433_v44, %v1433_v44  ;;  %vm1949_vm8 = vcmp.lt.s32.totalorder %v3324_v41, 111  ;;  %v2949_v41 = vld [vmem:[%s4042_s2 + $0x80] sm:$0xff]  }
  0x10   : > { %v3148_v0 = vld [vmem:[%s3145_s14] sm:$0xff]  ;;  %v3151_v1 = vld [vmem:[%s3145_s14 + $0x10] sm:$0xff]  ;;  %v3154_v2 = vld [vmem:[%s3145_s14 + $0x8] sm:$0xff]  ;;  %v3341_v53 = vrot.slane %v1263_v45, %v3330_v42  ;;  %v3344_v54 = vrot.slane %v644_v46, %v3330_v42  ;;  %v3347_v55 = vrot.slane %v637_v47, %v3330_v42  ;;  %v3350_v56 = vrot.slane %v1256_v48, %v3330_v42  ;;  %s3997_s27 = scalar_lea.vmem %s4048_s8, %s3139_s11  ;;  %s4003_s10 = scalar_lea.vmem %s4049_s9, %s3139_s11 }
  0x11   : > { %v3158_v3 = vpack.i.bf16 %v3151_v1, %v3148_v0  ;;  %v3161_v4 = vld [vmem:[%s3145_s14 + $0x18] sm:$0xff]  ;;  %v3172_v6 = vld [vmem:[%s3145_s14 + $0x28] sm:$0xff]  ;;  %v3178_v8 = vld [vmem:[%s3145_s14 + $0x20] sm:$0xff]  ;;  %v3359_v25 = vrot.slane %v1449_v51, %v3330_v42  ;;  %v3362_v26 = vrot.slane %v1442_v52, %v3330_v42 }
  0x12   : > { %v3169_v5 = vpack.i.bf16 %v3161_v4, %v3154_v2  ;;  %v3175_v7 = vld [vmem:[%s3145_s14 + $0x38] sm:$0xff]  ;;  %v3181_v9 = vld [vmem:[%s3145_s14 + $0x30] sm:$0xff]  ;;  %v3202_v12 = vld [vmem:[%s3199_s19 + $0x8] sm:$0xff] }
  0x13   : > { %2622 = vrot.lane.b32.xlu1 %v3158_v3, %s3071_s15  ;;  %2612 = vrot.lane.b32.xlu0 %v3158_v3, %s3072_s16  ;;  %v3189_v10 = vpack.i.bf16 %v3175_v7, %v3172_v6  ;;  %v3193_v11 = vpack.i.bf16 %v3181_v9, %v3178_v8  ;;  %v3205_v13 = vld [vmem:[%s3199_s19 + $0x18] sm:$0xff]  ;;  %v3208_v14 = vld [vmem:[%s3199_s19] sm:$0xff] }
  0x14   : > { %v3211_v15 = vld [vmem:[%s3199_s19 + $0x10] sm:$0xff]  ;;  %v3223_v16 = vpack.i.bf16 %v3205_v13, %v3202_v12  ;;  %v3234_v18 = vld [vmem:[%s3199_s19 + $0x28] sm:$0xff]  ;;  %v3237_v19 = vld [vmem:[%s3199_s19 + $0x38] sm:$0xff] }
  0x15   : > { %v3227_v17 = vpack.i.bf16 %v3211_v15, %v3208_v14  ;;  %v3240_v20 = vld [vmem:[%s3199_s19 + $0x20] sm:$0xff]  ;;  %v3243_v21 = vld [vmem:[%s3199_s19 + $0x30] sm:$0xff]  ;;  %v3251_v22 = vpack.i.bf16 %v3237_v19, %v3234_v18 }
  0x16   : > { %v3255_v23 = vpack.i.bf16 %v3243_v21, %v3240_v20 }
  0x17   : > { %2627 = vrot.lane.b32.xlu1 %v3169_v5, %s3071_s15  ;;  %2617 = vrot.lane.b32.xlu0 %v3169_v5, %s3072_s16 }
  0x1b   : > { %2637 = vrot.lane.b32.xlu1 %v3189_v10, %s3072_s16  ;;  %2632 = vrot.lane.b32.xlu0 %v3193_v11, %s3072_s16 }
  0x1f   : > { %2647 = vrot.lane.b32.xlu1 %v3189_v10, %s3071_s15  ;;  %2642 = vrot.lane.b32.xlu0 %v3193_v11, %s3071_s15 }
  0x23   : > { %2657 = vrot.lane.b32.xlu1 %v3223_v16, %s3072_s16  ;;  %2652 = vrot.lane.b32.xlu0 %v3227_v17, %s3072_s16 }
  0x27   : > { %2667 = vrot.lane.b32.xlu1 %v3223_v16, %s3071_s15  ;;  %2662 = vrot.lane.b32.xlu0 %v3227_v17, %s3071_s15 }
  0x2b   : > { %2677 = vrot.lane.b32.xlu1 %v3251_v22, %s3072_s16  ;;  %2672 = vrot.lane.b32.xlu0 %v3255_v23, %s3072_s16 }
  0x2f   : > { %2687 = vrot.lane.b32.xlu1 %v3251_v22, %s3071_s15  ;;  %2682 = vrot.lane.b32.xlu0 %v3255_v23, %s3071_s15 }
  0x33   : > { %2697 = vrot.lane.b32.xlu1 %v3169_v5, %s3074_s20  ;;  %2692 = vrot.lane.b32.xlu0 %v3158_v3, %s3074_s20 }
  0x37   : > { %2707 = vrot.lane.b32.xlu1 %v3189_v10, %s3074_s20  ;;  %2702 = vrot.lane.b32.xlu0 %v3193_v11, %s3074_s20 }
  0x3b   : > { %2717 = vrot.lane.b32.xlu1 %v3223_v16, %s3074_s20  ;;  %2712 = vrot.lane.b32.xlu0 %v3227_v17, %s3074_s20 }
  0x3f   : > { %2727 = vrot.lane.b32.xlu1 %v3251_v22, %s3074_s20  ;;  %2722 = vrot.lane.b32.xlu0 %v3255_v23, %s3074_s20 }
  0x43   : > { %2737 = vrot.lane.b32.xlu1 %v3169_v5, %s3075_s21  ;;  %2732 = vrot.lane.b32.xlu0 %v3158_v3, %s3075_s21 }
  0x47   : > { %2747 = vrot.lane.b32.xlu1 %v3169_v5, %s3076_s22  ;;  %2742 = vrot.lane.b32.xlu0 %v3158_v3, %s3076_s22 }
  0x4b   : > { %2757 = vrot.lane.b32.xlu1 %v3189_v10, %s3075_s21  ;;  %2752 = vrot.lane.b32.xlu0 %v3193_v11, %s3075_s21 }
  0x4f   : > { %2767 = vrot.lane.b32.xlu1 %v3189_v10, %s3076_s22  ;;  %2762 = vrot.lane.b32.xlu0 %v3193_v11, %s3076_s22 }
  0x53   : > { %2777 = vrot.lane.b32.xlu1 %v3223_v16, %s3075_s21  ;;  %2772 = vrot.lane.b32.xlu0 %v3227_v17, %s3075_s21 }
  0x57   : > { %2787 = vrot.lane.b32.xlu1 %v3223_v16, %s3076_s22  ;;  %2782 = vrot.lane.b32.xlu0 %v3227_v17, %s3076_s22 }
  0x5b   : > { %2797 = vrot.lane.b32.xlu1 %v3251_v22, %s3075_s21  ;;  %2792 = vrot.lane.b32.xlu0 %v3255_v23, %s3075_s21 }
  0x5f   : > { %2807 = vrot.lane.b32.xlu1 %v3251_v22, %s3076_s22  ;;  %2802 = vrot.lane.b32.xlu0 %v3255_v23, %s3076_s22 }
  0x63   : > { %2817 = vrot.lane.b32.xlu1 %v3169_v5, %s3077_s23  ;;  %2812 = vrot.lane.b32.xlu0 %v3158_v3, %s3077_s23 }
  0x67   : > { %2827 = vrot.lane.b32.xlu1 %v3169_v5, %s3078_s24  ;;  %2822 = vrot.lane.b32.xlu0 %v3158_v3, %s3078_s24 }
  0x6b   : > { %2837 = vrot.lane.b32.xlu1 %v3189_v10, %s3077_s23  ;;  %2832 = vrot.lane.b32.xlu0 %v3193_v11, %s3077_s23 }
  0x6f   : > { %2847 = vrot.lane.b32.xlu1 %v3189_v10, %s3078_s24  ;;  %2842 = vrot.lane.b32.xlu0 %v3193_v11, %s3078_s24 }
  0x73   : > { %2857 = vrot.lane.b32.xlu1 %v3223_v16, %s3077_s23  ;;  %2852 = vrot.lane.b32.xlu0 %v3227_v17, %s3077_s23 }
  0x77   : > { %2867 = vrot.lane.b32.xlu1 %v3223_v16, %s3078_s24  ;;  %2862 = vrot.lane.b32.xlu0 %v3227_v17, %s3078_s24 }
  0x7b   : > { %2877 = vrot.lane.b32.xlu1 %v3251_v22, %s3077_s23  ;;  %2872 = vrot.lane.b32.xlu0 %v3255_v23, %s3077_s23 }
  0x7f   : > { %2887 = vrot.lane.b32.xlu1 %v3251_v22, %s3078_s24  ;;  %2882 = vrot.lane.b32.xlu0 %v3255_v23, %s3078_s24 }
  0x83   : > { %2897 = vrot.lane.b32.xlu1 %v3169_v5, %s3080_s12  ;;  %2892 = vrot.lane.b32.xlu0 %v3158_v3, %s3080_s12 }
  0x85   : > { %v2623_v49 = vpop.permute.xlu1 %2622  ;;  %v2613_v50 = vpop.permute.xlu0 %2612 }
  0x86   : > { %v2625_v57 = vunpack.i.h.bf16 %v2623_v49  ;;  %v2624_v58 = vunpack.i.l.bf16 %v2623_v49  ;;  %v2615_v59 = vunpack.i.h.bf16 %v2613_v50  ;;  %v2614_v60 = vunpack.i.l.bf16 %v2613_v50 }
  0x87   : > { %2907 = vrot.lane.b32.xlu1 %v3189_v10, %s3080_s12  ;;  %2902 = vrot.lane.b32.xlu0 %v3193_v11, %s3080_s12  ;;  %v541_v11 = vpack.c.bf16 %v3161_v4, %v3154_v2 }
  0x89   : > { %v2628_v61 = vpop.permute.xlu1 %2627  ;;  %v2618_v62 = vpop.permute.xlu0 %2617 }
  0x8a   : > { %v2630_v63 = vunpack.i.h.bf16 %v2628_v61  ;;  %v2629_v3 = vunpack.i.l.bf16 %v2628_v61  ;;  %v2620_v5 = vunpack.i.h.bf16 %v2618_v62  ;;  %v2619_v10 = vunpack.i.l.bf16 %v2618_v62 }
  0x8b   : > { %2917 = vrot.lane.b32.xlu1 %v3223_v16, %s3080_s12  ;;  %2912 = vrot.lane.b32.xlu0 %v3227_v17, %s3080_s12 }
  0x8c   : > { %v1206_v27 = vsel %vm1205_vm1, %v2624_v58, %v2629_v3  ;;  %v1207_v28 = vsel %vm1205_vm1, %v2625_v57, %v2630_v63  ;;  %v588_v16 = vsel %vm587_vm0, %v2614_v60, %v2619_v10  ;;  %v589_v17 = vsel %vm587_vm0, %v2615_v59, %v2620_v5 }
  0x8d   : > { %v2638_v29 = vpop.permute.xlu1 %2637  ;;  %v2633_v30 = vpop.permute.xlu0 %2632  ;;  %v1223_v31 = vpack.c.bf16 %v1207_v28, %v1206_v27  ;;  %v605_v33 = vpack.c.bf16 %v589_v17, %v588_v16  ;;  %v596_v34 = vsel %vm587_vm0, %v2619_v10, %v2614_v60  ;;  %v597_v35 = vsel %vm587_vm0, %v2620_v5, %v2615_v59 }
  0x8e   : > { %v2640_v36 = vunpack.i.h.bf16 %v2638_v29  ;;  %v2639_v37 = vunpack.i.l.bf16 %v2638_v29  ;;  %v2635_v38 = vunpack.i.h.bf16 %v2633_v30  ;;  %v2634_v39 = vunpack.i.l.bf16 %v2633_v30 }
  0x8f   : > { %2927 = vrot.lane.b32.xlu1 %v3251_v22, %s3080_s12  ;;  %2922 = vrot.lane.b32.xlu0 %v3255_v23, %s3080_s12  ;;  %v1270_v40 = vmul.bf16 %v3341_v53, %v1223_v31  ;;  %v651_v43 = vmul.bf16 %v3344_v54, %v605_v33  ;;  %v604_v44 = vpack.c.bf16 %v597_v35, %v596_v34 }
  0x90   : > { %v591_v45 = vsel %vm587_vm0, %v2635_v38, %v2640_v36  ;;  %v599_v46 = vsel %vm587_vm0, %v2640_v36, %v2635_v38  ;;  %v590_v47 = vsel %vm587_vm0, %v2634_v39, %v2639_v37  ;;  %v598_v22 = vsel %vm587_vm0, %v2639_v37, %v2634_v39  ;;  %v2446_v37 = vld.sshfl [vmem:[%s4043_s3 + $0x2] sm:$0x11 pattern:$0x75316420] }
  0x91   : > { %v2648_v48 = vpop.permute.xlu1 %2647  ;;  %1298 = vmatprep.subr.bf16.mxu0 %v1270_v40  ;;  %v2643_v23 = vpop.permute.xlu0 %2642  ;;  %679 = vmatprep.subr.bf16.mxu1 %v651_v43  ;;  %v650_v49 = vmul.bf16 %v3347_v55, %v604_v44  ;;  %v1214_v50 = vsel %vm1205_vm1, %v2629_v3, %v2624_v58  ;;  %v1215_v51 = vsel %vm1205_vm1, %v2630_v63, %v2625_v57 }
  0x92   : > { %v2650_v52 = vunpack.i.h.bf16 %v2648_v48  ;;  %v2649_v59 = vunpack.i.l.bf16 %v2648_v48  ;;  %v2645_v60 = vunpack.i.h.bf16 %v2643_v23  ;;  %v2644_v61 = vunpack.i.l.bf16 %v2643_v23 }
  0x93   : > { %680 = vmatpush1.bf16.msra.mxu1 %v650_v49  ;;  %v1222_v62 = vpack.c.bf16 %v1215_v51, %v1214_v50  ;;  %v607_v5 = vpack.c.bf16 %v591_v45, %v590_v47  ;;  %v606_v10 = vpack.c.bf16 %v599_v46, %v598_v22  ;;  %v540_v27 = vpack.c.bf16 %v3151_v1, %v3148_v0 }
  0x94   : > { %v1209_v28 = vsel %vm1205_vm1, %v2645_v60, %v2650_v52  ;;  %v1217_v58 = vsel %vm1205_vm1, %v2650_v52, %v2645_v60  ;;  %v1208_v57 = vsel %vm1205_vm1, %v2644_v61, %v2649_v59  ;;  %v1216_v63 = vsel %vm1205_vm1, %v2649_v59, %v2644_v61 }
  0x95   : > { %v1269_v3 = vmul.bf16 %v3350_v56, %v1222_v62  ;;  %v2658_v16 = vpop.permute.xlu1 %2657  ;;  %v2653_v17 = vpop.permute.xlu0 %2652  ;;  %v653_v29 = vmul.bf16 %v3344_v54, %v607_v5  ;;  %v652_v30 = vmul.bf16 %v3347_v55, %v606_v10  ;;  %v1225_v31 = vpack.c.bf16 %v1209_v28, %v1208_v57 }
  0x96   : > { %v2660_v33 = vunpack.i.h.bf16 %v2658_v16  ;;  %v2659_v34 = vunpack.i.l.bf16 %v2658_v16  ;;  %v2655_v35 = vunpack.i.h.bf16 %v2653_v17  ;;  %v2654_v36 = vunpack.i.l.bf16 %v2653_v17 }
  0x97   : > { %1299 = vmatpush1.bf16.msra.mxu0 %v1269_v3  ;;  %681 = vmatprep.subr.bf16.mxu1 %v653_v29  ;;  %v1272_v38 = vmul.bf16 %v3341_v53, %v1225_v31  ;;  %v1224_v39 = vpack.c.bf16 %v1217_v58, %v1216_v63  ;;  %v543_v40 = vpack.c.bf16 %v3175_v7, %v3172_v6 }
  0x98   : > { %v593_v43 = vsel %vm587_vm0, %v2655_v35, %v2660_v33  ;;  %v601_v44 = vsel %vm587_vm0, %v2660_v33, %v2655_v35  ;;  %v592_v45 = vsel %vm587_vm0, %v2654_v36, %v2659_v34  ;;  %v600_v46 = vsel %vm587_vm0, %v2659_v34, %v2654_v36  ;;  %682 = vmatpush1.bf16.msra.mxu1 %v652_v30 }
  0x99   : > { %v2668_v47 = vpop.permute.xlu1 %2667  ;;  %v2663_v22 = vpop.permute.xlu0 %2662  ;;  %1300 = vmatprep.subr.bf16.mxu0 %v1272_v38  ;;  %v1271_v48 = vmul.bf16 %v3350_v56, %v1224_v39  ;;  %v609_v23 = vpack.c.bf16 %v593_v43, %v592_v45  ;;  %v608_v49 = vpack.c.bf16 %v601_v44, %v600_v46  ;;  %v868_v50 = vcombine.high %v2446_v37, %v2446_v37 }
  0x9a   : > { %v2670_v51 = vunpack.i.h.bf16 %v2668_v47  ;;  %v2669_v52 = vunpack.i.l.bf16 %v2668_v47  ;;  %v2665_v59 = vunpack.i.h.bf16 %v2663_v22  ;;  %v2664_v60 = vunpack.i.l.bf16 %v2663_v22 }
  0x9b   : > { %1301 = vmatpush1.bf16.msra.mxu0 %v1271_v48  ;;  %v655_v61 = vmul.bf16 %v3344_v54, %v609_v23  ;;  %v654_v62 = vmul.bf16 %v3347_v55, %v608_v49  ;;  %v542_v5 = vpack.c.bf16 %v3181_v9, %v3178_v8  ;;  %v545_v10 = vpack.c.bf16 %v3205_v13, %v3202_v12  ;;  %v2486_v48 = vld.sshfl [vmem:[%s4043_s3 + $0xc] sm:$0x11 pattern:$0x75316420] }
  0x9c   : > { %v1211_v28 = vsel %vm1205_vm1, %v2665_v59, %v2670_v51  ;;  %v1219_v58 = vsel %vm1205_vm1, %v2670_v51, %v2665_v59  ;;  %v1210_v57 = vsel %vm1205_vm1, %v2664_v60, %v2669_v52  ;;  %v1218_v63 = vsel %vm1205_vm1, %v2669_v52, %v2664_v60 }
  0x9d   : > { %v2678_v3 = vpop.permute.xlu1 %2677  ;;  %v2673_v16 = vpop.permute.xlu0 %2672  ;;  %683 = vmatprep.subr.bf16.mxu1 %v655_v61  ;;  %v1227_v17 = vpack.c.bf16 %v1211_v28, %v1210_v57  ;;  %v1226_v29 = vpack.c.bf16 %v1219_v58, %v1218_v63  ;;  %v544_v30 = vpack.c.bf16 %v3211_v15, %v3208_v14  ;;  %v882_v31 = vrot.slane %v868_v50, %v3313_v32 }
  0x9e   : > { %v2680_v33 = vunpack.i.h.bf16 %v2678_v3  ;;  %v2679_v34 = vunpack.i.l.bf16 %v2678_v3  ;;  %v2675_v35 = vunpack.i.h.bf16 %v2673_v16  ;;  %v2674_v36 = vunpack.i.l.bf16 %v2673_v16  ;;  %684 = vmatpush1.bf16.msra.mxu1 %v654_v62 }
  0x9f   : > { %v1274_v38 = vmul.bf16 %v3341_v53, %v1227_v17  ;;  %v1273_v39 = vmul.bf16 %v3350_v56, %v1226_v29  ;;  %v547_v43 = vpack.c.bf16 %v3237_v19, %v3234_v18  ;;  %v875_v44 = vrot.slane %v2446_v37, %v3313_v32 }
  0xa0   : > { %v595_v45 = vsel %vm587_vm0, %v2675_v35, %v2680_v33  ;;  %v603_v46 = vsel %vm587_vm0, %v2680_v33, %v2675_v35  ;;  %v594_v47 = vsel %vm587_vm0, %v2674_v36, %v2679_v34  ;;  %v602_v22 = vsel %vm587_vm0, %v2679_v34, %v2674_v36 }
  0xa1   : > { %v2688_v23 = vpop.permute.xlu1 %2687  ;;  %v2683_v49 = vpop.permute.xlu0 %2682  ;;  %1302 = vmatprep.subr.bf16.mxu0 %v1274_v38  ;;  %v611_v37 = vpack.c.bf16 %v595_v45, %v594_v47  ;;  %v610_v50 = vpack.c.bf16 %v603_v46, %v602_v22  ;;  %v546_v51 = vpack.c.bf16 %v3243_v21, %v3240_v20  ;;  %v891_v52 = vpack.i.b16 %v882_v31, %v882_v31 }
  0xa2   : > { %v2690_v59 = vunpack.i.h.bf16 %v2688_v23  ;;  %v2689_v60 = vunpack.i.l.bf16 %v2688_v23  ;;  %v2685_v61 = vunpack.i.h.bf16 %v2683_v49  ;;  %v2684_v62 = vunpack.i.l.bf16 %v2683_v49  ;;  %1303 = vmatpush1.bf16.msra.mxu0 %v1273_v39 }
  0xa3   : > { %v657_v28 = vmul.bf16 %v3344_v54, %v611_v37  ;;  %v656_v58 = vmul.bf16 %v3347_v55, %v610_v50  ;;  %v884_v57 = vpack.i.b16 %v875_v44, %v875_v44  ;;  %v1612_v63 = vcombine.high %v2486_v48, %v2486_v48  ;;  %v2933_v55 = vld [vmem:[%s4042_s2] sm:$0xff]  }
  0xa4   : > { %v1213_v3 = vsel %vm1205_vm1, %v2685_v61, %v2690_v59  ;;  %v1221_v16 = vsel %vm1205_vm1, %v2690_v59, %v2685_v61  ;;  %v1212_v17 = vsel %vm1205_vm1, %v2684_v62, %v2689_v60  ;;  %v1220_v29 = vsel %vm1205_vm1, %v2689_v60, %v2684_v62  ;;  %v2934_v59 = vld [vmem:[%s4042_s2 + $0x30] sm:$0xff]  }
  0xa5   : > { %v2698_v31 = vpop.permute.xlu1 %2697  ;;  %v2693_v33 = vpop.permute.xlu0 %2692  ;;  %685 = vmatprep.subr.bf16.mxu1 %v657_v28  ;;  %v1229_v54 = vpack.c.bf16 %v1213_v3, %v1212_v17  ;;  %v1228_v34 = vpack.c.bf16 %v1221_v16, %v1220_v29  ;;  %v3473_v35 = vrot.slane %v891_v52, %v3330_v42  ;;  %v3476_v36 = vrot.slane %v2486_v48, %v3313_v32 }
  0xa6   : > { %v2700_v38 = vunpack.i.h.bf16 %v2698_v31  ;;  %v2699_v39 = vunpack.i.l.bf16 %v2698_v31  ;;  %v2695_v44 = vunpack.i.h.bf16 %v2693_v33  ;;  %v2694_v45 = vunpack.i.l.bf16 %v2693_v33  ;;  %686 = vmatpush1.bf16.msra.mxu1 %v656_v58 }
  0xa7   : > { %v1276_v46 = vmul.bf16 %v3341_v53, %v1229_v54  ;;  %v1275_v47 = vmul.bf16 %v3350_v56, %v1228_v34  ;;  %748 = vmatprep.subr.bf16.mxu1 %v541_v11  ;;  %v3484_v22 = vrot.slane %v884_v57, %v3330_v42  ;;  %v3487_v23 = vrot.slane %v1612_v63, %v3313_v32 }
  0xa8   : > { %v1393_v48 = vsel %vm1391_vm2, %v2695_v44, %v2700_v38  ;;  %v1401_v49 = vsel %vm1391_vm2, %v2700_v38, %v2695_v44  ;;  %v1392_v53 = vsel %vm1391_vm2, %v2694_v45, %v2699_v39  ;;  %v1400_v56 = vsel %vm1391_vm2, %v2699_v39, %v2694_v45 }
  0xa9   : > { %v1408_v37 = vpack.c.bf16 %v1393_v48, %v1392_v53  ;;  %v2708_v11 = vpop.permute.xlu1 %2707  ;;  %v2703_v50 = vpop.permute.xlu0 %2702  ;;  %1304 = vmatprep.subr.bf16.mxu0 %v1276_v46  ;;  %v1409_v52 = vpack.c.bf16 %v1401_v49, %v1400_v56  ;;  %2439 = vmatmul.mubr.msk.bf16.vlgmr.msra.gmra.mrb[0].mxu1 %vm672_vm3, %v2933_v55  ;;  %v1628_v60 = vpack.i.b16 %v3476_v36, %v3476_v36 }
  0xaa   : > { %v2710_v61 = vunpack.i.h.bf16 %v2708_v11  ;;  %v2709_v62 = vunpack.i.l.bf16 %v2708_v11  ;;  %v2705_v28 = vunpack.i.h.bf16 %v2703_v50  ;;  %v2704_v58 = vunpack.i.l.bf16 %v2703_v50  ;;  %1305 = vmatpush1.bf16.msra.mxu0 %v1275_v47  ;;  %749 = vmatpush1.bf16.msra.mxu1 %v540_v27 }
  0xab   : > { %v1456_v57 = vmul.bf16 %v3359_v25, %v1409_v52  ;;  %v1455_v63 = vmul.bf16 %v3362_v26, %v1408_v37  ;;  %750 = vmatprep.subr.bf16.mxu1 %v543_v40  ;;  %721 = vmatprep.mubr.bf16.mxu1 %v3073_v24  ;;  %v383_v3 = vadd.f32 %v3154_v2, %v3148_v0  ;;  %v2935_v0 = vld [vmem:[%s4042_s2 + $0x8] sm:$0xff]  }
  0xac   : > { %v1395_v16 = vsel %vm1391_vm2, %v2705_v28, %v2710_v61  ;;  %v1403_v17 = vsel %vm1391_vm2, %v2710_v61, %v2705_v28  ;;  %v1394_v27 = vsel %vm1391_vm2, %v2704_v58, %v2709_v62  ;;  %v1402_v29 = vsel %vm1391_vm2, %v2709_v62, %v2704_v58 }
  0xad   : > { %v1410_v31 = vpack.c.bf16 %v1395_v16, %v1394_v27  ;;  %v2718_v33 = vpop.permute.xlu1 %2717  ;;  %v2713_v40 = vpop.permute.xlu0 %2712  ;;  %1484 = vmatprep.subr.bf16.mxu0 %v1456_v57  ;;  %2473 = vmatmul.mubr.msk.bf16.vlgmr.msra.gmra.mrb[0].mxu0 %vm672_vm3, %v2934_v59  ;;  %v1411_v54 = vpack.c.bf16 %v1403_v17, %v1402_v29  ;;  %v1635_v2 = vpack.i.b16 %v3487_v23, %v3487_v23 }
  0xae   : > { %v2720_v34 = vunpack.i.h.bf16 %v2718_v33  ;;  %v2719_v55 = vunpack.i.l.bf16 %v2718_v33  ;;  %v2715_v38 = vunpack.i.h.bf16 %v2713_v40  ;;  %v2714_v39 = vunpack.i.l.bf16 %v2713_v40  ;;  %1485 = vmatpush1.bf16.msra.mxu0 %v1455_v63  ;;  %751 = vmatpush1.bf16.msra.mxu1 %v542_v5 }
  0xaf   : > { %v1458_v44 = vmul.bf16 %v3359_v25, %v1411_v54  ;;  %v1457_v45 = vmul.bf16 %v3362_v26, %v1410_v31  ;;  %752 = vmatprep.subr.bf16.mxu1 %v545_v10  ;;  %1340 = vmatprep.mubr.bf16.mxu0 %v3073_v24  ;;  %v386_v46 = vadd.f32 %v3161_v4, %v3151_v1  ;;  %v2936_v1 = vld [vmem:[%s4042_s2 + $0x38] sm:$0xff]  }
  0xb0   : > { %v1397_v47 = vsel %vm1391_vm2, %v2715_v38, %v2720_v34  ;;  %v1405_v48 = vsel %vm1391_vm2, %v2720_v34, %v2715_v38  ;;  %v1396_v5 = vsel %vm1391_vm2, %v2714_v39, %v2719_v55  ;;  %v1404_v49 = vsel %vm1391_vm2, %v2719_v55, %v2714_v39  ;;  %384 = vadd.xlane.f32.xlu0 %v383_v3 }
  0xb1   : > { %v1412_v53 = vpack.c.bf16 %v1397_v47, %v1396_v5  ;;  %v2728_v10 = vpop.permute.xlu1 %2727  ;;  %v2723_v56 = vpop.permute.xlu0 %2722  ;;  %1486 = vmatprep.subr.bf16.mxu0 %v1458_v44  ;;  %v1413_v37 = vpack.c.bf16 %v1405_v48, %v1404_v49  ;;  %2440 = vmatmul.mubr.msk.bf16.gmra.mrb[4].mxu1 %vm672_vm3, %v2935_v0  ;;  %v389_v4 = vadd.f32 %v3172_v6, %v3178_v8 }
  0xb2   : > { %v2730_v11 = vunpack.i.h.bf16 %v2728_v10  ;;  %v2729_v50 = vunpack.i.l.bf16 %v2728_v10  ;;  %v2725_v52 = vunpack.i.h.bf16 %v2723_v56  ;;  %v2724_v59 = vunpack.i.l.bf16 %v2723_v56  ;;  %1487 = vmatpush1.bf16.msra.mxu0 %v1457_v45  ;;  %753 = vmatpush1.bf16.msra.mxu1 %v544_v30 }
  0xb3   : > { %v1460_v61 = vmul.bf16 %v3359_v25, %v1413_v37  ;;  %v1459_v62 = vmul.bf16 %v3362_v26, %v1412_v53  ;;  %754 = vmatprep.subr.bf16.mxu1 %v547_v43  ;;  %780 = vmatprep.mubr.bf16.mxu1 %v3073_v24  ;;  %v399_v6 = vadd.f32 %v3202_v12, %v3208_v14  ;;  %v2937_v14 = vld [vmem:[%s4042_s2 + $0x40] sm:$0xff]  }
  0xb4   : > { %v1399_v8 = vsel %vm1391_vm2, %v2725_v52, %v2730_v11  ;;  %v1407_v28 = vsel %vm1391_vm2, %v2730_v11, %v2725_v52  ;;  %v1398_v30 = vsel %vm1391_vm2, %v2724_v59, %v2729_v50  ;;  %v1406_v58 = vsel %vm1391_vm2, %v2729_v50, %v2724_v59  ;;  %387 = vadd.xlane.f32.xlu1 %v386_v46 }
  0xb5   : > { %v1414_v57 = vpack.c.bf16 %v1399_v8, %v1398_v30  ;;  %v2738_v43 = vpop.permute.xlu1 %2737  ;;  %v2733_v63 = vpop.permute.xlu0 %2732  ;;  %1488 = vmatprep.subr.bf16.mxu0 %v1460_v61  ;;  %v1415_v12 = vpack.c.bf16 %v1407_v28, %v1406_v58  ;;  %2474 = vmatmul.mubr.msk.bf16.gmra.mrb[4].mxu0 %vm672_vm3, %v2936_v1  ;;  %v392_v3 = vadd.f32 %v3175_v7, %v3181_v9 }
  0xb6   : > { %v2740_v16 = vunpack.i.h.bf16 %v2738_v43  ;;  %v2739_v17 = vunpack.i.l.bf16 %v2738_v43  ;;  %v2735_v27 = vunpack.i.h.bf16 %v2733_v63  ;;  %v2734_v29 = vunpack.i.l.bf16 %v2733_v63  ;;  %1489 = vmatpush1.bf16.msra.mxu0 %v1459_v62  ;;  %755 = vmatpush1.bf16.msra.mxu1 %v546_v51 }
  0xb7   : > { %v1462_v31 = vmul.bf16 %v3359_v25, %v1415_v12  ;;  %v1461_v33 = vmul.bf16 %v3362_v26, %v1414_v57  ;;  %1516 = vmatprep.mubr.bf16.mxu0 %v3073_v24  ;;  %400 = vadd.xlane.f32.xlu0 %v399_v6  ;;  %v402_v40 = vadd.f32 %v3205_v13, %v3211_v15  ;;  %v2938_v15 = vld [vmem:[%s4042_s2 + $0x50] sm:$0xff]  }
  0xb8   : > { %v835_v7 = vsel %vm833_vm4, %v2735_v27, %v2740_v16  ;;  %v843_v9 = vsel %vm833_vm4, %v2740_v16, %v2735_v27  ;;  %v834_v54 = vsel %vm833_vm4, %v2734_v29, %v2739_v17  ;;  %v842_v25 = vsel %vm833_vm4, %v2739_v17, %v2734_v29  ;;  %390 = vadd.xlane.f32.xlu1 %v389_v4  ;;  %v2456_v27 = vld.sshfl [vmem:[%s4043_s3 + $0x4] sm:$0x11 pattern:$0x75316420] }
  0xb9   : > { %v850_v26 = vpack.c.bf16 %v843_v9, %v842_v25  ;;  %v2748_v51 = vpop.permute.xlu1 %2747  ;;  %v2743_v0 = vpop.permute.xlu0 %2742  ;;  %1490 = vmatprep.subr.bf16.mxu0 %v1462_v31  ;;  %v851_v13 = vpack.c.bf16 %v835_v7, %v834_v54  ;;  %2443 = vmatmul.mubr.msk.bf16.vlgmr.msra.gmra.mrb[0].mxu1 %vm672_vm3, %v2937_v14  ;;  %v3604_v34 = vrot.slane %v1628_v60, %v3330_v42 }
  0xba   : > { %v2750_v55 = vunpack.i.h.bf16 %v2748_v51  ;;  %v2749_v38 = vunpack.i.l.bf16 %v2748_v51  ;;  %v2745_v39 = vunpack.i.h.bf16 %v2743_v0  ;;  %v2744_v44 = vunpack.i.l.bf16 %v2743_v0  ;;  %1491 = vmatpush1.bf16.msra.mxu0 %v1461_v33  ;;  %790 = vmatprep.mubr.bf16.mxu1 %v3073_v24 }
  0xbb   : > { %v898_v45 = vmul.bf16 %v3473_v35, %v851_v13  ;;  %v897_v46 = vmul.bf16 %v3484_v22, %v850_v26  ;;  %v3613_v47 = vrot.slane %v1635_v2, %v3330_v42  ;;  %403 = vadd.xlane.f32.xlu0 %v402_v40  ;;  %v405_v36 = vadd.f32 %v3234_v18, %v3240_v20  ;;  %v2939_v18 = vld [vmem:[%s4042_s2 + $0x48] sm:$0xff]  }
  0xbc   : > { %v1579_v60 = vsel %vm1577_vm5, %v2745_v39, %v2750_v55  ;;  %v1587_v48 = vsel %vm1577_vm5, %v2750_v55, %v2745_v39  ;;  %v1578_v5 = vsel %vm1577_vm5, %v2744_v44, %v2749_v38  ;;  %v1586_v49 = vsel %vm1577_vm5, %v2749_v38, %v2744_v44  ;;  %393 = vadd.xlane.f32.xlu1 %v392_v3 }
  0xbd   : > { %v1594_v23 = vpack.c.bf16 %v1579_v60, %v1578_v5  ;;  %v2758_v2 = vpop.permute.xlu1 %2757  ;;  %v2753_v53 = vpop.permute.xlu0 %2752  ;;  %926 = vmatprep.subr.bf16.mxu1 %v898_v45  ;;  %v1595_v10 = vpack.c.bf16 %v1587_v48, %v1586_v49  ;;  %2483 = vmatmul.mubr.msk.bf16.vlgmr.msra.gmra.mrb[0].mxu0 %vm672_vm3, %v2938_v15  ;;  %v408_v50 = vadd.f32 %v3237_v19, %v3243_v21  ;;  %v2940_v19 = vld [vmem:[%s4042_s2 + $0x58] sm:$0xff]   ;;  %v2496_v49 = vld.sshfl [vmem:[%s4043_s3 + $0xe] sm:$0x11 pattern:$0x75316420] }
  0xbe   : > { %v2760_v20 = vunpack.i.h.bf16 %v2758_v2  ;;  %v2759_v56 = vunpack.i.l.bf16 %v2758_v2  ;;  %v2755_v37 = vunpack.i.h.bf16 %v2753_v53  ;;  %v2754_v1 = vunpack.i.l.bf16 %v2753_v53  ;;  %927 = vmatpush1.bf16.msra.mxu1 %v897_v46  ;;  %1526 = vmatprep.mubr.bf16.mxu0 %v3073_v24 }
  0xbf   : > { %v1642_v4 = vmul.bf16 %v3613_v47, %v1595_v10  ;;  %v1641_v11 = vmul.bf16 %v3604_v34, %v1594_v23  ;;  %406 = vadd.xlane.f32.xlu0 %v405_v36  ;;  %v1054_v0 = vcombine.high %v2456_v27, %v2456_v27  ;;  %v2103_v23 = vld [vmem:[%s4044_s4] sm:$0xff] }
  0xc0   : > { %v837_v52 = vsel %vm833_vm4, %v2755_v37, %v2760_v20  ;;  %v845_v59 = vsel %vm833_vm4, %v2760_v20, %v2755_v37  ;;  %v836_v61 = vsel %vm833_vm4, %v2754_v1, %v2759_v56  ;;  %v844_v62 = vsel %vm833_vm4, %v2759_v56, %v2754_v1 }
  0xc1   : > { %v852_v6 = vpack.c.bf16 %v845_v59, %v844_v62  ;;  %v2768_v8 = vpop.permute.xlu1 %2767  ;;  %v2763_v28 = vpop.permute.xlu0 %2762  ;;  %1670 = vmatprep.subr.bf16.mxu0 %v1642_v4  ;;  %v853_v30 = vpack.c.bf16 %v837_v52, %v836_v61  ;;  %2444 = vmatmul.mubr.msk.bf16.gmra.mrb[4].mxu1 %vm672_vm3, %v2939_v18  ;;  %v1068_v10 = vrot.slane %v1054_v0, %v3313_v32 }
  0xc2   : > { %v2770_v21 = vunpack.i.h.bf16 %v2768_v8  ;;  %v2769_v58 = vunpack.i.l.bf16 %v2768_v8  ;;  %v2765_v57 = vunpack.i.h.bf16 %v2763_v28  ;;  %v2764_v43 = vunpack.i.l.bf16 %v2763_v28  ;;  %1671 = vmatpush1.bf16.msra.mxu0 %v1641_v11  ;;  %958 = vmatprep.mubr.bf16.mxu1 %v3073_v24  ;;  %v2105_v28 = vld [vmem:[%s4044_s4 + $0x10] sm:$0xff] }
  0xc3   : > { %v900_v63 = vmul.bf16 %v3473_v35, %v853_v30  ;;  %v899_v12 = vmul.bf16 %v3484_v22, %v852_v6  ;;  %409 = vadd.xlane.f32.xlu0 %v408_v50  ;;  %v3682_v18 = vrot.slane %v2456_v27, %v3313_v32  ;;  %v1798_v59 = vcombine.high %v2496_v49, %v2496_v49 }
  0xc4   : > { %v1581_v14 = vsel %vm1577_vm5, %v2765_v57, %v2770_v21  ;;  %v1589_v3 = vsel %vm1577_vm5, %v2770_v21, %v2765_v57  ;;  %v1580_v16 = vsel %vm1577_vm5, %v2764_v43, %v2769_v58  ;;  %v1588_v17 = vsel %vm1577_vm5, %v2769_v58, %v2764_v43 }
  0xc5   : > { %v1596_v29 = vpack.c.bf16 %v1581_v14, %v1580_v16  ;;  %v2778_v31 = vpop.permute.xlu1 %2777  ;;  %v2773_v33 = vpop.permute.xlu0 %2772  ;;  %928 = vmatprep.subr.bf16.mxu1 %v900_v63  ;;  %v1597_v40 = vpack.c.bf16 %v1589_v3, %v1588_v17  ;;  %2484 = vmatmul.mubr.msk.bf16.gmra.mrb[4].mxu0 %vm672_vm3, %v2940_v19  ;;  %v1077_v21 = vpack.i.b16 %v1068_v10, %v1068_v10 }
  0xc6   : > { %v2780_v7 = vunpack.i.h.bf16 %v2778_v31  ;;  %v2779_v9 = vunpack.i.l.bf16 %v2778_v31  ;;  %v2775_v54 = vunpack.i.h.bf16 %v2773_v33  ;;  %v2774_v25 = vunpack.i.l.bf16 %v2773_v33  ;;  %929 = vmatpush1.bf16.msra.mxu1 %v899_v12  ;;  %1702 = vmatprep.mubr.bf16.mxu0 %v3073_v24 }
  0xc7   : > { %v1644_v26 = vmul.bf16 %v3613_v47, %v1597_v40  ;;  %v1643_v51 = vmul.bf16 %v3604_v34, %v1596_v29  ;;  %v1070_v58 = vpack.i.b16 %v3682_v18, %v3682_v18  ;;  %v1812_v27 = vrot.slane %v1798_v59, %v3313_v32 }
  0xc8   : > { %v839_v13 = vsel %vm833_vm4, %v2775_v54, %v2780_v7  ;;  %v847_v15 = vsel %vm833_vm4, %v2780_v7, %v2775_v54  ;;  %v838_v55 = vsel %vm833_vm4, %v2774_v25, %v2779_v9  ;;  %v846_v38 = vsel %vm833_vm4, %v2779_v9, %v2774_v25  ;;  %v2106_v7 = vld [vmem:[%s4044_s4 + $0x18] sm:$0xff] }
  0xc9   : > { %v854_v39 = vpack.c.bf16 %v847_v15, %v846_v38  ;;  %v2788_v44 = vpop.permute.xlu1 %2787  ;;  %v2783_v45 = vpop.permute.xlu0 %2782  ;;  %1672 = vmatprep.subr.bf16.mxu0 %v1644_v26  ;;  %v855_v46 = vpack.c.bf16 %v839_v13, %v838_v55  ;;  %v3714_v25 = vrot.slane %v1077_v21, %v3330_v42  ;;  %v1805_v26 = vrot.slane %v2496_v49, %v3313_v32 }
  0xca   : > { %v2790_v36 = vunpack.i.h.bf16 %v2788_v44  ;;  %v2789_v60 = vunpack.i.l.bf16 %v2788_v44  ;;  %v2785_v48 = vunpack.i.h.bf16 %v2783_v45  ;;  %v2784_v5 = vunpack.i.l.bf16 %v2783_v45  ;;  %1673 = vmatpush1.bf16.msra.mxu0 %v1643_v51 }
  0xcb   : > { %v902_v2 = vmul.bf16 %v3473_v35, %v855_v46  ;;  %v901_v53 = vmul.bf16 %v3484_v22, %v854_v39  ;;  %v2941_v39 = vld [vmem:[%s4042_s2 + $0x10] sm:$0xff]   ;;  %v1821_v44 = vpack.i.b16 %v1812_v27, %v1812_v27  ;;  %v3732_v49 = vrot.slane %v1070_v58, %v3330_v42  ;;  %v2136_v58 = vld [vmem:[%s4045_s5 + $0x8] sm:$0xff] }
  0xcc   : > { %v1583_v20 = vsel %vm1577_vm5, %v2785_v48, %v2790_v36  ;;  %v1591_v56 = vsel %vm1577_vm5, %v2790_v36, %v2785_v48  ;;  %v1582_v37 = vsel %vm1577_vm5, %v2784_v5, %v2789_v60  ;;  %v1590_v1 = vsel %vm1577_vm5, %v2789_v60, %v2784_v5 }
  0xcd   : > { %v1598_v4 = vpack.c.bf16 %v1583_v20, %v1582_v37  ;;  %v2798_v11 = vpop.permute.xlu1 %2797  ;;  %v2793_v50 = vpop.permute.xlu0 %2792  ;;  %930 = vmatprep.subr.bf16.mxu1 %v902_v2  ;;  %v1599_v52 = vpack.c.bf16 %v1591_v56, %v1590_v1  ;;  %2109 = vperm.xlu1 %2931, %v2103_v23   ;;  %v1814_v23 = vpack.i.b16 %v1805_v26, %v1805_v26 }
  0xce   : > { %v2800_v61 = vunpack.i.h.bf16 %v2798_v11  ;;  %v2799_v62 = vunpack.i.l.bf16 %v2798_v11  ;;  %v2795_v6 = vunpack.i.h.bf16 %v2793_v50  ;;  %v2794_v8 = vunpack.i.l.bf16 %v2793_v50  ;;  %931 = vmatpush1.bf16.msra.mxu1 %v901_v53  ;;  %v2942_v11 = vld [vmem:[%s4042_s2 + $0x60] sm:$0xff]  }
  0xcf   : > { %v1646_v30 = vmul.bf16 %v3613_v47, %v1599_v52  ;;  %v1645_v19 = vmul.bf16 %v3604_v34, %v1598_v4  ;;  %v3751_v4 = vrot.slane %v1821_v44, %v3330_v42 }
  0xd0   : > { %v841_v57 = vsel %vm833_vm4, %v2795_v6, %v2800_v61  ;;  %v849_v43 = vsel %vm833_vm4, %v2800_v61, %v2795_v6  ;;  %v840_v63 = vsel %vm833_vm4, %v2794_v8, %v2799_v62  ;;  %v848_v12 = vsel %vm833_vm4, %v2799_v62, %v2794_v8 }
  0xd1   : > { %v856_v14 = vpack.c.bf16 %v849_v43, %v848_v12  ;;  %v2808_v3 = vpop.permute.xlu1 %2807  ;;  %v2803_v16 = vpop.permute.xlu0 %2802  ;;  %1674 = vmatprep.subr.bf16.mxu0 %v1646_v30  ;;  %v857_v17 = vpack.c.bf16 %v841_v57, %v840_v63  ;;  %2119 = vperm.xlu1 %2931, %v2105_v28   ;;  %v3760_v8 = vrot.slane %v1814_v23, %v3330_v42 }
  0xd2   : > { %v2810_v29 = vunpack.i.h.bf16 %v2808_v3  ;;  %v2809_v31 = vunpack.i.l.bf16 %v2808_v3  ;;  %v2805_v33 = vunpack.i.h.bf16 %v2803_v16  ;;  %v2804_v40 = vunpack.i.l.bf16 %v2803_v16  ;;  %1675 = vmatpush1.bf16.msra.mxu0 %v1645_v19 }
  0xd3   : > { %v904_v9 = vmul.bf16 %v3473_v35, %v857_v17  ;;  %v903_v54 = vmul.bf16 %v3484_v22, %v856_v14  ;;  %v2943_v14 = vld [vmem:[%s4042_s2 + $0x18] sm:$0xff]  }
  0xd4   : > { %v1585_v51 = vsel %vm1577_vm5, %v2805_v33, %v2810_v29  ;;  %v1593_v0 = vsel %vm1577_vm5, %v2810_v29, %v2805_v33  ;;  %v1584_v13 = vsel %vm1577_vm5, %v2804_v40, %v2809_v31  ;;  %v1592_v15 = vsel %vm1577_vm5, %v2809_v31, %v2804_v40 }
  0xd5   : > { %v1600_v35 = vpack.c.bf16 %v1585_v51, %v1584_v13  ;;  %v2818_v55 = vpop.permute.xlu1 %2817  ;;  %v2813_v22 = vpop.permute.xlu0 %2812  ;;  %932 = vmatprep.subr.bf16.mxu1 %v904_v9  ;;  %v1601_v38 = vpack.c.bf16 %v1593_v0, %v1592_v15  ;;  %2124 = vperm.xlu1 %2931, %v2106_v7   ;;  %v2944_v15 = vld [vmem:[%s4042_s2 + $0x68] sm:$0xff]  }
  0xd6   : > { %v2820_v45 = vunpack.i.h.bf16 %v2818_v55  ;;  %v2819_v46 = vunpack.i.l.bf16 %v2818_v55  ;;  %v2815_v36 = vunpack.i.h.bf16 %v2813_v22  ;;  %v2814_v60 = vunpack.i.l.bf16 %v2813_v22  ;;  %933 = vmatpush1.bf16.msra.mxu1 %v903_v54  ;;  %v2137_v54 = vld [vmem:[%s4045_s5 + $0x10] sm:$0xff] }
  0xd7   : > { %v1648_v48 = vmul.bf16 %v3613_v47, %v1601_v38  ;;  %v1647_v5 = vmul.bf16 %v3604_v34, %v1600_v35  ;;  %v2135_v34 = vld [vmem:[%s4045_s5] sm:$0xff]  ;;  %v2104_v47 = vld [vmem:[%s4044_s4 + $0x8] sm:$0xff] }
  0xd8   : > { %v1021_v2 = vsel %vm1019_vm6, %v2815_v36, %v2820_v45  ;;  %v1029_v53 = vsel %vm1019_vm6, %v2820_v45, %v2815_v36  ;;  %v1020_v10 = vsel %vm1019_vm6, %v2814_v60, %v2819_v46  ;;  %v1028_v18 = vsel %vm1019_vm6, %v2819_v46, %v2814_v60 }
  0xd9   : > { %v1036_v20 = vpack.c.bf16 %v1029_v53, %v1028_v18  ;;  %v2828_v56 = vpop.permute.xlu1 %2827  ;;  %v2823_v37 = vpop.permute.xlu0 %2822  ;;  %1676 = vmatprep.subr.bf16.mxu0 %v1648_v48  ;;  %v1037_v1 = vpack.c.bf16 %v1021_v2, %v1020_v10  ;;  %2453 = vmatmul.mubr.msk.bf16.vlgmr.msra.gmra.mrb[0].mxu1 %vm672_vm3, %v2941_v39  ;;  %v2138_v48 = vld [vmem:[%s4045_s5 + $0x18] sm:$0xff] }
  0xda   : > { %v2830_v50 = vunpack.i.h.bf16 %v2828_v56  ;;  %v2829_v52 = vunpack.i.l.bf16 %v2828_v56  ;;  %v2825_v59 = vunpack.i.h.bf16 %v2823_v37  ;;  %v2824_v61 = vunpack.i.l.bf16 %v2823_v37  ;;  %1677 = vmatpush1.bf16.msra.mxu0 %v1647_v5  ;;  %968 = vmatprep.mubr.bf16.mxu1 %v3073_v24 }
  0xdb   : > { %v1084_v62 = vmul.bf16 %v3714_v25, %v1037_v1  ;;  %v1083_v6 = vmul.bf16 %v3732_v49, %v1036_v20  ;;  %2141 = vperm.xlu1 %2931, %v2135_v34   ;;  %2114 = vperm.xlu0 %2932, %v2104_v47  }
  0xdc   : > { %v1765_v28 = vsel %vm1763_vm7, %v2825_v59, %v2830_v50  ;;  %v1773_v30 = vsel %vm1763_vm7, %v2830_v50, %v2825_v59  ;;  %v1764_v19 = vsel %vm1763_vm7, %v2824_v61, %v2829_v52  ;;  %v1772_v21 = vsel %vm1763_vm7, %v2829_v52, %v2824_v61  ;;  %v2506_v52 = vld.sshfl [vmem:[%s4043_s3 + $0x10] sm:$0x11 pattern:$0x75316420] }
  0xdd   : > { %v1780_v57 = vpack.c.bf16 %v1765_v28, %v1764_v19  ;;  %v2838_v43 = vpop.permute.xlu1 %2837  ;;  %v2833_v63 = vpop.permute.xlu0 %2832  ;;  %1112 = vmatprep.subr.bf16.mxu1 %v1084_v62  ;;  %v1781_v12 = vpack.c.bf16 %v1773_v30, %v1772_v21  ;;  %2493 = vmatmul.mubr.msk.bf16.vlgmr.msra.gmra.mrb[0].mxu0 %vm672_vm3, %v2942_v11 }
  0xde   : > { %v2840_v3 = vunpack.i.h.bf16 %v2838_v43  ;;  %v2839_v16 = vunpack.i.l.bf16 %v2838_v43  ;;  %v2835_v17 = vunpack.i.h.bf16 %v2833_v63  ;;  %v2834_v27 = vunpack.i.l.bf16 %v2833_v63  ;;  %1113 = vmatpush1.bf16.msra.mxu1 %v1083_v6  ;;  %1712 = vmatprep.mubr.bf16.mxu0 %v3073_v24 }
  0xdf   : > { %v1828_v29 = vmul.bf16 %v3751_v4, %v1781_v12  ;;  %v1827_v31 = vmul.bf16 %v3760_v8, %v1780_v57  ;;  %2146 = vperm.xlu1 %2931, %v2136_v58   ;;  %v1984_v43 = vcombine.high %v2506_v52, %v2506_v52 }
  0xe0   : > { %v1023_v33 = vsel %vm1019_vm6, %v2835_v17, %v2840_v3  ;;  %v1031_v40 = vsel %vm1019_vm6, %v2840_v3, %v2835_v17  ;;  %v1022_v7 = vsel %vm1019_vm6, %v2834_v27, %v2839_v16  ;;  %v1030_v9 = vsel %vm1019_vm6, %v2839_v16, %v2834_v27 }
  0xe1   : > { %v1038_v26 = vpack.c.bf16 %v1031_v40, %v1030_v9  ;;  %v2848_v51 = vpop.permute.xlu1 %2847  ;;  %v2843_v0 = vpop.permute.xlu0 %2842  ;;  %1856 = vmatprep.subr.bf16.mxu0 %v1828_v29  ;;  %v1039_v13 = vpack.c.bf16 %v1023_v33, %v1022_v7  ;;  %2454 = vmatmul.mubr.msk.bf16.gmra.mrb[4].mxu1 %vm672_vm3, %v2943_v14 }
  0xe2   : > { %v2850_v35 = vunpack.i.h.bf16 %v2848_v51  ;;  %v2849_v55 = vunpack.i.l.bf16 %v2848_v51  ;;  %v2845_v22 = vunpack.i.h.bf16 %v2843_v0  ;;  %v2844_v38 = vunpack.i.l.bf16 %v2843_v0  ;;  %1857 = vmatpush1.bf16.msra.mxu0 %v1827_v31  ;;  %1144 = vmatprep.mubr.bf16.mxu1 %v3073_v24 }
  0xe3   : > { %v1086_v39 = vmul.bf16 %v3714_v25, %v1039_v13  ;;  %v1085_v44 = vmul.bf16 %v3732_v49, %v1038_v26  ;;  %2151 = vperm.xlu1 %2931, %v2137_v54   ;;  %v1998_v26 = vrot.slane %v1984_v43, %v3313_v32  ;;  %v1991_v51 = vrot.slane %v2506_v52, %v3313_v32 }
  0xe4   : > { %v1767_v45 = vsel %vm1763_vm7, %v2845_v22, %v2850_v35  ;;  %v1775_v46 = vsel %vm1763_vm7, %v2850_v35, %v2845_v22  ;;  %v1766_v36 = vsel %vm1763_vm7, %v2844_v38, %v2849_v55  ;;  %v1774_v60 = vsel %vm1763_vm7, %v2849_v55, %v2844_v38 }
  0xe5   : > { %v1782_v5 = vpack.c.bf16 %v1767_v45, %v1766_v36  ;;  %v2858_v23 = vpop.permute.xlu1 %2857  ;;  %v2853_v2 = vpop.permute.xlu0 %2852  ;;  %1114 = vmatprep.subr.bf16.mxu1 %v1086_v39  ;;  %v1783_v53 = vpack.c.bf16 %v1775_v46, %v1774_v60  ;;  %2494 = vmatmul.mubr.msk.bf16.gmra.mrb[4].mxu0 %vm672_vm3, %v2944_v15 }
  0xe6   : > { %v2860_v10 = vunpack.i.h.bf16 %v2858_v23  ;;  %v2859_v18 = vunpack.i.l.bf16 %v2858_v23  ;;  %v2855_v34 = vunpack.i.h.bf16 %v2853_v2  ;;  %v2854_v47 = vunpack.i.l.bf16 %v2853_v2  ;;  %1115 = vmatpush1.bf16.msra.mxu1 %v1085_v44  ;;  %1888 = vmatprep.mubr.bf16.mxu0 %v3073_v24 }
  0xe7   : > { %v1830_v20 = vmul.bf16 %v3751_v4, %v1783_v53  ;;  %v1829_v56 = vmul.bf16 %v3760_v8, %v1782_v5  ;;  %2156 = vperm.xlu1 %2931, %v2138_v48   ;;  %v2007_v48 = vpack.i.b16 %v1998_v26, %v1998_v26  ;;  %v2000_v5 = vpack.i.b16 %v1991_v51, %v1991_v51 }
  0xe8   : > { %v1025_v37 = vsel %vm1019_vm6, %v2855_v34, %v2860_v10  ;;  %v1033_v1 = vsel %vm1019_vm6, %v2860_v10, %v2855_v34  ;;  %v1024_v11 = vsel %vm1019_vm6, %v2854_v47, %v2859_v18  ;;  %v1032_v50 = vsel %vm1019_vm6, %v2859_v18, %v2854_v47 }
  0xe9   : > { %v1040_v59 = vpack.c.bf16 %v1033_v1, %v1032_v50  ;;  %v2868_v61 = vpop.permute.xlu1 %2867  ;;  %v2863_v62 = vpop.permute.xlu0 %2862  ;;  %1858 = vmatprep.subr.bf16.mxu0 %v1830_v20  ;;  %v1041_v6 = vpack.c.bf16 %v1025_v37, %v1024_v11  ;;  %v3863_v52 = vrot.slane %v2007_v48, %v3330_v42 }
  0xea   : > { %v2870_v28 = vunpack.i.h.bf16 %v2868_v61  ;;  %v2869_v30 = vunpack.i.l.bf16 %v2868_v61  ;;  %v2865_v19 = vunpack.i.h.bf16 %v2863_v62  ;;  %v2864_v21 = vunpack.i.l.bf16 %v2863_v62  ;;  %1859 = vmatpush1.bf16.msra.mxu0 %v1829_v56 }
  0xeb   : > { %v1088_v58 = vmul.bf16 %v3714_v25, %v1041_v6  ;;  %v1087_v57 = vmul.bf16 %v3732_v49, %v1040_v59  ;;  %v3866_v59 = vrot.slane %v2000_v5, %v3330_v42  ;;  %v2946_v42 = vld [vmem:[%s4042_s2 + $0x70] sm:$0xff]  }
  0xec   : > { %v1769_v63 = vsel %vm1763_vm7, %v2865_v19, %v2870_v28  ;;  %v1777_v12 = vsel %vm1763_vm7, %v2870_v28, %v2865_v19  ;;  %v1768_v14 = vsel %vm1763_vm7, %v2864_v21, %v2869_v30  ;;  %v1776_v3 = vsel %vm1763_vm7, %v2869_v30, %v2864_v21 }
  0xed   : > { %v1784_v16 = vpack.c.bf16 %v1769_v63, %v1768_v14  ;;  %v2878_v17 = vpop.permute.xlu1 %2877  ;;  %v2873_v27 = vpop.permute.xlu0 %2872  ;;  %1116 = vmatprep.subr.bf16.mxu1 %v1088_v58  ;;  %v1785_v29 = vpack.c.bf16 %v1777_v12, %v1776_v3 }
  0xee   : > { %v2880_v31 = vunpack.i.h.bf16 %v2878_v17  ;;  %v2879_v33 = vunpack.i.l.bf16 %v2878_v17  ;;  %v2875_v40 = vunpack.i.h.bf16 %v2873_v27  ;;  %v2874_v7 = vunpack.i.l.bf16 %v2873_v27  ;;  %1117 = vmatpush1.bf16.msra.mxu1 %v1087_v57 }
  0xef   : > { %v1832_v9 = vmul.bf16 %v3751_v4, %v1785_v29  ;;  %v1831_v54 = vmul.bf16 %v3760_v8, %v1784_v16 }
  0xf0   : > { %v1027_v0 = vsel %vm1019_vm6, %v2875_v40, %v2880_v31  ;;  %v1035_v13 = vsel %vm1019_vm6, %v2880_v31, %v2875_v40  ;;  %v1026_v15 = vsel %vm1019_vm6, %v2874_v7, %v2879_v33  ;;  %v1034_v35 = vsel %vm1019_vm6, %v2879_v33, %v2874_v7  ;;  %v2947_v33 = vld [vmem:[%s4042_s2 + $0x28] sm:$0xff]  }
  0xf1   : > { %v1042_v55 = vpack.c.bf16 %v1035_v13, %v1034_v35  ;;  %v2888_v22 = vpop.permute.xlu1 %2887  ;;  %v2883_v38 = vpop.permute.xlu0 %2882  ;;  %1860 = vmatprep.subr.bf16.mxu0 %v1832_v9  ;;  %v1043_v39 = vpack.c.bf16 %v1027_v0, %v1026_v15 }
  0xf2   : > { %v2890_v44 = vunpack.i.h.bf16 %v2888_v22  ;;  %v2889_v45 = vunpack.i.l.bf16 %v2888_v22  ;;  %v2885_v32 = vunpack.i.h.bf16 %v2883_v38  ;;  %v2884_v46 = vunpack.i.l.bf16 %v2883_v38  ;;  %1861 = vmatpush1.bf16.msra.mxu0 %v1831_v54 }
  0xf3   : > { %v1090_v36 = vmul.bf16 %v3714_v25, %v1043_v39  ;;  %v1089_v60 = vmul.bf16 %v3732_v49, %v1042_v55  ;;  %v2945_v49 = vld [vmem:[%s4042_s2 + $0x20] sm:$0xff]  }
  0xf4   : > { %v1771_v23 = vsel %vm1763_vm7, %v2885_v32, %v2890_v44  ;;  %v1779_v2 = vsel %vm1763_vm7, %v2890_v44, %v2885_v32  ;;  %v1770_v53 = vsel %vm1763_vm7, %v2884_v46, %v2889_v45  ;;  %v1778_v10 = vsel %vm1763_vm7, %v2889_v45, %v2884_v46  ;;  %v2948_v44 = vld [vmem:[%s4042_s2 + $0x78] sm:$0xff]  }
  0xf5   : > { %v1786_v18 = vpack.c.bf16 %v1771_v23, %v1770_v53  ;;  %v2898_v34 = vpop.permute.xlu1 %2897  ;;  %v2893_v25 = vpop.permute.xlu0 %2892  ;;  %1118 = vmatprep.subr.bf16.mxu1 %v1090_v36  ;;  %v1787_v47 = vpack.c.bf16 %v1779_v2, %v1778_v10 }
  0xf6   : > { %v2900_v20 = vunpack.i.h.bf16 %v2898_v34  ;;  %v2899_v56 = vunpack.i.l.bf16 %v2898_v34  ;;  %v2895_v37 = vunpack.i.h.bf16 %v2893_v25  ;;  %v2894_v1 = vunpack.i.l.bf16 %v2893_v25  ;;  %1119 = vmatpush1.bf16.msra.mxu1 %v1089_v60 }
  0xf7   : > { %v1834_v11 = vmul.bf16 %v3751_v4, %v1787_v47  ;;  %v1833_v50 = vmul.bf16 %v3760_v8, %v1786_v18  ;;  %v2950_v47 = vld [vmem:[%s4042_s2 + $0x88] sm:$0xff]  }
  0xf8   : > { %v1951_v61 = vsel %vm1949_vm8, %v2895_v37, %v2900_v20  ;;  %v1959_v62 = vsel %vm1949_vm8, %v2900_v20, %v2895_v37  ;;  %v1950_v6 = vsel %vm1949_vm8, %v2894_v1, %v2899_v56  ;;  %v1958_v4 = vsel %vm1949_vm8, %v2899_v56, %v2894_v1  ;;  %v416_v1 = vld [vmem:[%s4046_s6 + $0x8] sm:$0xff] }
  0xf9   : > { %v1966_v28 = vpack.c.bf16 %v1951_v61, %v1950_v6  ;;  %v2908_v8 = vpop.permute.xlu1 %2907  ;;  %v2903_v30 = vpop.permute.xlu0 %2902  ;;  %2463 = vmatmul.mubr.msk.bf16.vlgmr.msra.gmra.mrb[0].mxu1 %vm672_vm3, %v2945_v49  ;;  %1862 = vmatprep.subr.bf16.mxu0 %v1834_v11  ;;  %v1967_v19 = vpack.c.bf16 %v1959_v62, %v1958_v4  ;;  %v417_v62 = vld [vmem:[%s4046_s6 + $0x10] sm:$0xff] }
  0xfa   : > { %v2910_v21 = vunpack.i.h.bf16 %v2908_v8  ;;  %v2909_v58 = vunpack.i.l.bf16 %v2908_v8  ;;  %v2905_v57 = vunpack.i.h.bf16 %v2903_v30  ;;  %v2904_v43 = vunpack.i.l.bf16 %v2903_v30  ;;  %1863 = vmatpush1.bf16.msra.mxu0 %v1833_v50  ;;  %1154 = vmatprep.mubr.bf16.mxu1 %v3073_v24 }
  0xfb   : > { %v2014_v63 = vmul.bf16 %v3863_v52, %v1967_v19  ;;  %v2013_v12 = vmul.bf16 %v3866_v59, %v1966_v28 }
  0xfc   : > { %v1953_v14 = vsel %vm1949_vm8, %v2905_v57, %v2910_v21  ;;  %v1961_v3 = vsel %vm1949_vm8, %v2910_v21, %v2905_v57  ;;  %v1952_v16 = vsel %vm1949_vm8, %v2904_v43, %v2909_v58  ;;  %v1960_v17 = vsel %vm1949_vm8, %v2909_v58, %v2904_v43  ;;  %v418_v58 = vld [vmem:[%s4046_s6 + $0x18] sm:$0xff] }
  0xfd   : > { %v1968_v27 = vpack.c.bf16 %v1953_v14, %v1952_v16  ;;  %v2918_v29 = vpop.permute.xlu1 %2917  ;;  %v2913_v31 = vpop.permute.xlu0 %2912  ;;  %2503 = vmatmul.mubr.msk.bf16.vlgmr.msra.gmra.mrb[0].mxu0 %vm672_vm3, %v2946_v42  ;;  %2042 = vmatprep.subr.bf16.mxu0 %v2014_v63  ;;  %v1969_v40 = vpack.c.bf16 %v1961_v3, %v1960_v17 }
  0xfe   : > { %v2920_v7 = vunpack.i.h.bf16 %v2918_v29  ;;  %v2919_v9 = vunpack.i.l.bf16 %v2918_v29  ;;  %v2915_v54 = vunpack.i.h.bf16 %v2913_v31  ;;  %v2914_v26 = vunpack.i.l.bf16 %v2913_v31  ;;  %2521 = vmatprep.subr.bf16.mxu1 %v2014_v63  ;;  %2043 = vmatpush1.bf16.msra.mxu0 %v2013_v12 }
  0xff   : > { %2525 = vmatpush1.bf16.msra.mxu1 %v2013_v12  ;;  %v2016_v51 = vmul.bf16 %v3863_v52, %v1969_v40  ;;  %v2015_v0 = vmul.bf16 %v3866_v59, %v1968_v27  ;;  %1898 = vmatprep.mubr.bf16.mxu0 %v3073_v24 }
 0x100   : > { %v1955_v13 = vsel %vm1949_vm8, %v2915_v54, %v2920_v7  ;;  %v1963_v15 = vsel %vm1949_vm8, %v2920_v7, %v2915_v54  ;;  %v1954_v35 = vsel %vm1949_vm8, %v2914_v26, %v2919_v9  ;;  %v1962_v55 = vsel %vm1949_vm8, %v2919_v9, %v2914_v26 }
 0x101   : > { %v1970_v22 = vpack.c.bf16 %v1955_v13, %v1954_v35  ;;  %v2928_v38 = vpop.permute.xlu1 %2927  ;;  %v2923_v39 = vpop.permute.xlu0 %2922  ;;  %2464 = vmatmul.mubr.msk.bf16.gmra.mrb[4].mxu1 %vm672_vm3, %v2947_v33  ;;  %2044 = vmatprep.subr.bf16.mxu0 %v2016_v51  ;;  %v1971_v45 = vpack.c.bf16 %v1963_v15, %v1962_v55 }
 0x102   : > { %v2930_v32 = vunpack.i.h.bf16 %v2928_v38  ;;  %v2929_v46 = vunpack.i.l.bf16 %v2928_v38  ;;  %v2925_v36 = vunpack.i.h.bf16 %v2923_v39  ;;  %v2924_v60 = vunpack.i.l.bf16 %v2923_v39  ;;  %2522 = vmatprep.subr.bf16.mxu1 %v2016_v51  ;;  %2045 = vmatpush1.bf16.msra.mxu0 %v2015_v0 }
 0x103   : > { %2526 = vmatpush1.bf16.msra.mxu1 %v2015_v0  ;;  %v2018_v48 = vmul.bf16 %v3863_v52, %v1971_v45  ;;  %v2017_v5 = vmul.bf16 %v3866_v59, %v1970_v22  ;;  %2084 = vmatprep.mubr.bf16.mxu1 %v3073_v24 }
 0x104   : > { %v1957_v23 = vsel %vm1949_vm8, %v2925_v36, %v2930_v32  ;;  %v1965_v2 = vsel %vm1949_vm8, %v2930_v32, %v2925_v36  ;;  %v1956_v53 = vsel %vm1949_vm8, %v2924_v60, %v2929_v46  ;;  %v1964_v10 = vsel %vm1949_vm8, %v2929_v46, %v2924_v60  ;;  %v439_v36 = vld [vmem:[%s4047_s7 + $0x8] sm:$0xff] }
 0x105   : > { %v1972_v18 = vpack.c.bf16 %v1957_v23, %v1956_v53  ;;  %2504 = vmatmul.mubr.msk.bf16.gmra.mrb[4].mxu0 %vm672_vm3, %v2948_v44  ;;  %2046 = vmatprep.subr.bf16.mxu0 %v2018_v48  ;;  %v1973_v34 = vpack.c.bf16 %v1965_v2, %v1964_v10  ;;  %v440_v23 = vld [vmem:[%s4047_s7 + $0x10] sm:$0xff] }
 0x106   : > { %2523 = vmatprep.subr.bf16.mxu1 %v2018_v48  ;;  %2047 = vmatpush1.bf16.msra.mxu0 %v2017_v5  ;;  %v438_v48 = vld [vmem:[%s4047_s7] sm:$0xff] }
 0x107   : > { %2527 = vmatpush1.bf16.msra.mxu1 %v2017_v5  ;;  %v2020_v25 = vmul.bf16 %v3863_v52, %v1973_v34  ;;  %v2019_v49 = vmul.bf16 %v3866_v59, %v1972_v18  ;;  %2074 = vmatprep.mubr.bf16.mxu0 %v3073_v24  ;;  %v415_v24 = vld [vmem:[%s4046_s6] sm:$0xff]  ;;  %v441_v5 = vld [vmem:[%s4047_s7 + $0x18] sm:$0xff] }
 0x109   : > { %2048 = vmatprep.subr.bf16.mxu0 %v2020_v25  ;;  %2524 = vmatprep.subr.bf16.mxu1 %v2020_v25 }
 0x10a   : > { %2049 = vmatpush1.bf16.msra.mxu0 %v2019_v49 }
 0x10b   : > { %2528 = vmatpush1.bf16.msra.mxu1 %v2019_v49 }
 0x10d   : > { %2513 = vmatmul.mubr.msk.bf16.vlgmr.msra.gmra.mrb[0].mxu0 %vm672_vm3, %v2949_v41 }
 0x10e   : > { %2514 = vmatmul.mubr.msk.bf16.vlgmr.msra.gmra.mrb[8].mxu1 %vm672_vm3, %v2950_v47 }
 0x13d   : > { %v385_v20 = vpop.xlane.xlu0 %384 }
 0x13e   : > { %v395_v56 = vmul.f32 0.00390625, %v385_v20 }
 0x140   : > { %v419_v37 = vmul.f32 %v415_v24, %v395_v56 }
 0x141   : > { %v388_v11 = vpop.xlane.xlu1 %387 }
 0x142   : > { %v396_v50 = vmul.f32 0.00390625, %v388_v11  ;;  %v424_v59 = vsel %vm423_vm9, %v419_v37, 0.0 }
 0x144   : > { %v420_v52 = vmul.f32 %v416_v1, %v396_v50  ;;  %v401_v61 = vpop.xlane.xlu0 %400 }
 0x145   : > { %v391_v6 = vpop.xlane.xlu1 %390  ;;  %v411_v4 = vmul.f32 0.00390625, %v401_v61 }
 0x146   : > { %v425_v28 = vsel %vm423_vm9, %v420_v52, 0.0  ;;  %v397_v8 = vmul.f32 0.00390625, %v391_v6 }
 0x147   : > { %v426_v30 = vadd.f32 %v425_v28, %v424_v59  ;;  %v482_v42 = vmul.f32 %v415_v24, %v411_v4 }
 0x148   : > { %v421_v19 = vmul.f32 %v417_v62, %v397_v8  ;;  %v404_v21 = vpop.xlane.xlu0 %403 }
 0x149   : > { %v394_v57 = vpop.xlane.xlu1 %393  ;;  %v412_v43 = vmul.f32 0.00390625, %v404_v21  ;;  %v486_v3 = vsel %vm423_vm9, %v482_v42, 0.0 }
 0x14a   : > { %v427_v63 = vsel %vm423_vm9, %v421_v19, 0.0  ;;  %v398_v12 = vmul.f32 0.00390625, %v394_v57 }
 0x14b   : > { %v428_v14 = vadd.f32 %v427_v63, %v426_v30  ;;  %v483_v16 = vmul.f32 %v416_v1, %v412_v43 }
 0x14c   : > { %v422_v17 = vmul.f32 %v418_v58, %v398_v12  ;;  %v407_v27 = vpop.xlane.xlu0 %406 }
 0x14d   : > { %v487_v29 = vsel %vm423_vm9, %v483_v16, 0.0  ;;  %v413_v31 = vmul.f32 0.00390625, %v407_v27  ;;  %v2110_v4 = vpop.permute.xlu1 %2109 }
 0x14e   : > { %v429_v33 = vsel %vm423_vm9, %v422_v17, 0.0  ;;  %v488_v40 = vadd.f32 %v487_v29, %v486_v3 }
 0x14f   : > { %v430_v7 = vadd.f32 %v429_v33, %v428_v14  ;;  %v484_v9 = vmul.f32 %v417_v62, %v413_v31 }
 0x150   : > { %v410_v54 = vpop.xlane.xlu0 %409 }
 0x151   : > { %v431_v26 = vrot.slane %v430_v7, 4  ;;  %v489_v51 = vsel %vm423_vm9, %v484_v9, 0.0  ;;  %v414_v0 = vmul.f32 0.00390625, %v410_v54  ;;  %v2120_v28 = vpop.permute.xlu1 %2119 }
 0x152   : > { %v490_v13 = vadd.f32 %v489_v51, %v488_v40 }
 0x153   : > { %v432_v15 = vadd.f32 %v431_v26, %v430_v7  ;;  %v485_v35 = vmul.f32 %v418_v58, %v414_v0 }
 0x155   : > { %v433_v55 = vrot.slane %v432_v15, 2  ;;  %v491_v22 = vsel %vm423_vm9, %v485_v35, 0.0  ;;  %v2125_v30 = vpop.permute.xlu1 %2124 }
 0x156   : > { %v492_v38 = vadd.f32 %v491_v22, %v490_v13 }
 0x157   : > { %v434_v39 = vadd.f32 %v433_v55, %v432_v15 }
 0x158   : > { %v493_v44 = vrot.slane %v492_v38, 4 }
 0x159   : > { %v435_v45 = vrot.slane %v434_v39, 1 }
 0x15a   : > { %v494_v32 = vadd.f32 %v493_v44, %v492_v38  ;;  %v2142_v58 = vpop.permute.xlu1 %2141  ;;  %v2115_v54 = vpop.permute.xlu0 %2114 }
 0x15b   : > { %v436_v46 = vadd.f32 %v435_v45, %v434_v39 }
 0x15c   : > { %v495_v60 = vrot.slane %v494_v32, 2 }
 0x15d   : > { %v437_v2 = vmax.f32 %v436_v46, 0.0 }
 0x15e   : > { %v496_v53 = vadd.f32 %v495_v60, %v494_v32  ;;  %v2147_v3 = vpop.permute.xlu1 %2146 }
 0x15f   : > { %v443_v10 = vmul.f32 %v439_v36, %v437_v2  ;;  %v442_v18 = vmul.f32 %v438_v48, %v437_v2  ;;  %v445_v34 = vmul.f32 %v441_v5, %v437_v2  ;;  %v444_v25 = vmul.f32 %v440_v23, %v437_v2 }
 0x160   : > { %v497_v49 = vrot.slane %v496_v53, 1 }
 0x161   : > { %v449_v41 = vsel %vm423_vm9, %v443_v10, 0.0  ;;  %v446_v47 = vsel %vm423_vm9, %v442_v18, 0.0  ;;  %v455_v20 = vsel %vm423_vm9, %v445_v34, 0.0  ;;  %v452_v56 = vsel %vm423_vm9, %v444_v25, 0.0 }
 0x162   : > { %450 = vadd.xlane.f32.xlu0 %v449_v41  ;;  %447 = vadd.xlane.f32.xlu1 %v446_v47  ;;  %v498_v24 = vadd.f32 %v497_v49, %v496_v53  ;;  %v2152_v7 = vpop.permute.xlu1 %2151 }
 0x164   : > { %v499_v37 = vmax.f32 %v498_v24, 0.0 }
 0x166   : > { %456 = vadd.xlane.f32.xlu0 %v455_v20  ;;  %453 = vadd.xlane.f32.xlu1 %v452_v56  ;;  %v501_v1 = vmul.f32 %v499_v37, %v439_v36  ;;  %v500_v11 = vmul.f32 %v499_v37, %v438_v48  ;;  %v503_v50 = vmul.f32 %v499_v37, %v441_v5  ;;  %v2157_v49 = vpop.permute.xlu1 %2156 }
 0x167   : > { %v502_v52 = vmul.f32 %v499_v37, %v440_v23 }
 0x168   : > { %v507_v59 = vsel %vm423_vm9, %v501_v1, 0.0  ;;  %v504_v61 = vsel %vm423_vm9, %v500_v11, 0.0  ;;  %v513_v62 = vsel %vm423_vm9, %v503_v50, 0.0 }
 0x169   : > { %v510_v6 = vsel %vm423_vm9, %v502_v52, 0.0 }
 0x16a   : > { %508 = vadd.xlane.f32.xlu0 %v507_v59  ;;  %505 = vadd.xlane.f32.xlu1 %v504_v61 }
 0x16e   : > { %514 = vadd.xlane.f32.xlu0 %v513_v62  ;;  %511 = vadd.xlane.f32.xlu1 %v510_v6 }
 0x1cc   : > { %v1146_v8 = vpop.f32.mrb[0].mxu1 }
 0x1cd   : > { %v1148_v42 = vpop.f32.mrb[1].mxu1 }
 0x1ce   : > { %v1150_v19 = vpop.f32.mrb[2].mxu1 }
 0x1cf   : > { %v1152_v21 = vpop.f32.mrb[3].mxu1 }
 0x1d4   : > { %v1156_v57 = vpop.f32.mrb[4].mxu1 }
 0x1d5   : > { %v1158_v43 = vpop.f32.mrb[5].mxu1 }
 0x1d6   : > { %v1160_v63 = vpop.f32.mrb[6].mxu1 }
 0x1d7   : > { %v1162_v12 = vpop.f32.mrb[7].mxu1 }
 0x1d8   : > { %v1900_v14 = vpop.f32.mrb[4].mxu0 }
 0x1d9   : > { %v2533_v16 = vadd.f32 %v1900_v14, %v1156_v57  ;;  %v1902_v17 = vpop.f32.mrb[5].mxu0 }
 0x1da   : > { %v2535_v27 = vadd.f32 %v1902_v17, %v1158_v43  ;;  %v1904_v29 = vpop.f32.mrb[6].mxu0 }
 0x1db   : > { %v2537_v31 = vadd.f32 %v1904_v29, %v1160_v63  ;;  %v1906_v33 = vpop.f32.mrb[7].mxu0 }
 0x1dc   : > { %v2539_v40 = vadd.f32 %v1906_v33, %v1162_v12 }
 0x1e0   : > { %v2076_v9 = vpop.f32.mrb[0].mxu0 }
 0x1e1   : > { %v2529_v26 = vadd.f32 %v2076_v9, %v1146_v8  ;;  %v2086_v51 = vpop.f32.mrb[8].mxu1  ;;  %v2078_v0 = vpop.f32.mrb[1].mxu0 }
 0x1e2   : > { %v2534_v13 = vadd.f32 %v2533_v16, %v2086_v51  ;;  %v2530_v15 = vadd.f32 %v2078_v0, %v1148_v42  ;;  %v2088_v35 = vpop.f32.mrb[9].mxu1  ;;  %v2080_v55 = vpop.f32.mrb[2].mxu0 }
 0x1e3   : > { %v2127_v22 = vmul.f32 %v2529_v26, %v2110_v4  ;;  %v2536_v38 = vadd.f32 %v2535_v27, %v2088_v35  ;;  %v2531_v39 = vadd.f32 %v2080_v55, %v1150_v19  ;;  %v2090_v44 = vpop.f32.mrb[10].mxu1  ;;  %v2082_v45 = vpop.f32.mrb[3].mxu0 }
 0x1e4   : > { %v2131_v32 = vmul.f32 %v2534_v13, %v2120_v28  ;;  %v2128_v46 = vmul.f32 %v2530_v15, %v2110_v4  ;;  %v2538_v36 = vadd.f32 %v2537_v31, %v2090_v44  ;;  %v2532_v60 = vadd.f32 %v2082_v45, %v1152_v21  ;;  %v2092_v48 = vpop.f32.mrb[11].mxu1 }
 0x1e5   : > { %v3973_v5 = vadd.f32 %v2142_v58, %v2127_v22  ;;  %v2132_v23 = vmul.f32 %v2536_v38, %v2120_v28  ;;  %v2540_v2 = vadd.f32 %v2539_v40, %v2092_v48  ;;  %v2129_v53 = vmul.f32 %v2531_v39, %v2115_v54 }
 0x1e6   : > { %v3975_v10 = vadd.f32 %v2152_v7, %v2131_v32  ;;  %v3977_v18 = vadd.f32 %v2142_v58, %v2128_v46  ;;  %v2133_v34 = vmul.f32 %v2538_v36, %v2125_v30  ;;  %v2130_v25 = vmul.f32 %v2532_v60, %v2115_v54 }
 0x1e7   : > { %v2167_v41 = vsub.f32 0.0, %v3973_v5  ;;  %v2164_v47 = vadd.f32 %v2152_v7, %v2132_v23  ;;  %v2134_v24 = vmul.f32 %v2540_v2, %v2125_v30  ;;  %v3980_v20 = vadd.f32 %v2147_v3, %v2129_v53 }
 0x1e8   : > { %v2171_v56 = vsub.f32 0.0, %v3975_v10  ;;  %v2168_v37 = vsub.f32 0.0, %v3977_v18  ;;  %v2165_v1 = vadd.f32 %v2157_v49, %v2133_v34  ;;  %v3984_v11 = vadd.f32 %v2147_v3, %v2130_v25 }
 0x1e9   : > { %v2175_v50 = vmul.f32 1.442695, %v2167_v41  ;;  %v2172_v52 = vsub.f32 0.0, %v2164_v47  ;;  %v2166_v59 = vadd.f32 %v2157_v49, %v2134_v24  ;;  %v2169_v61 = vsub.f32 0.0, %v3980_v20 }
 0x1ea   : > { %v2183_v62 = vmul.f32 1.442695, %v2171_v56  ;;  %v2177_v6 = vmul.f32 1.442695, %v2168_v37  ;;  %v2173_v4 = vsub.f32 0.0, %v2165_v1  ;;  %v2170_v28 = vsub.f32 0.0, %v3984_v11 }
 0x1eb   : > { %2951 = vpow2.f32 %v2175_v50  ;;  %v2185_v8 = vmul.f32 1.442695, %v2172_v52  ;;  %v2174_v30 = vsub.f32 0.0, %v2166_v59  ;;  %v2179_v21 = vmul.f32 1.442695, %v2169_v61 }
 0x1ec   : > { %2953 = vpow2.f32 %v2183_v62  ;;  %v2187_v42 = vmul.f32 1.442695, %v2173_v4  ;;  %v2181_v58 = vmul.f32 1.442695, %v2170_v28 }
 0x1ed   : > { %2955 = vpow2.f32 %v2177_v6  ;;  %v2189_v19 = vmul.f32 1.442695, %v2174_v30 }
 0x1ee   : > { %2957 = vpow2.f32 %v2185_v8 }
 0x1ef   : > { %2959 = vpow2.f32 %v2187_v42  ;;  %v448_v53 = vpop.xlane.xlu1 %447 }
 0x1f0   : > { %2961 = vpow2.f32 %v2189_v19  ;;  %v458_v49 = vsub.f32 0.0, %v448_v53 }
 0x1f1   : > { %2963 = vpow2.f32 %v2179_v21 }
 0x1f2   : > { %2965 = vpow2.f32 %v2181_v58  ;;  %v462_v37 = vmul.f32 1.442695, %v458_v49 }
 0x1f5   : > { %v2952_v57 = vpop.eup %2951 }
 0x1f6   : > { %v2954_v43 = vpop.eup %2953  ;;  %v2191_v63 = vadd.f32 1.0, %v2952_v57 }
 0x1f7   : > { %v2956_v12 = vpop.eup %2955  ;;  %v2195_v14 = vadd.f32 1.0, %v2954_v43 }
 0x1f8   : > { %v2958_v3 = vpop.eup %2957  ;;  %2967 = vrcp.f32 %v2191_v63  ;;  %v2192_v16 = vadd.f32 1.0, %v2956_v12 }
 0x1f9   : > { %v2960_v17 = vpop.eup %2959  ;;  %2969 = vrcp.f32 %v2195_v14  ;;  %v2196_v27 = vadd.f32 1.0, %v2958_v3 }
 0x1fa   : > { %v2962_v29 = vpop.eup %2961  ;;  %2971 = vrcp.f32 %v2192_v16  ;;  %v2197_v31 = vadd.f32 1.0, %v2960_v17 }
 0x1fb   : > { %v2964_v33 = vpop.eup %2963  ;;  %2973 = vrcp.f32 %v2196_v27  ;;  %v2198_v40 = vadd.f32 1.0, %v2962_v29 }
 0x1fc   : > { %v2966_v7 = vpop.eup %2965  ;;  %2975 = vrcp.f32 %v2197_v31  ;;  %v2193_v9 = vadd.f32 1.0, %v2964_v33 }
 0x1fd   : > { %2977 = vrcp.f32 %v2198_v40  ;;  %v2194_v54 = vadd.f32 1.0, %v2966_v7 }
 0x1fe   : > { %2979 = vrcp.f32 %v2193_v9 }
 0x1ff   : > { %2981 = vrcp.f32 %v2194_v54 }
 0x200   : > { %2983 = vpow2.f32 %v462_v37 }
 0x202   : > { %v2968_v26 = vpop.eup %2967 }
 0x203   : > { %v2970_v51 = vpop.eup %2969  ;;  %v2207_v0 = vmul.f32 %v2968_v26, %v3973_v5 }
 0x204   : > { %v2972_v13 = vpop.eup %2971  ;;  %v2211_v15 = vmul.f32 %v2970_v51, %v3975_v10  ;;  %v451_v10 = vpop.xlane.xlu0 %450 }
 0x205   : > { %v2974_v35 = vpop.eup %2973  ;;  %v2208_v55 = vmul.f32 %v2972_v13, %v3977_v18  ;;  %v454_v18 = vpop.xlane.xlu1 %453  ;;  %v459_v56 = vsub.f32 0.0, %v451_v10 }
 0x206   : > { %v2976_v22 = vpop.eup %2975  ;;  %v2212_v38 = vmul.f32 %v2974_v35, %v2164_v47 }
 0x207   : > { %v2978_v39 = vpop.eup %2977  ;;  %v2215_v44 = vadd.f32 %v2208_v55, %v2207_v0  ;;  %v2213_v45 = vmul.f32 %v2976_v22, %v2165_v1  ;;  %v460_v1 = vsub.f32 0.0, %v454_v18  ;;  %v464_v52 = vmul.f32 1.442695, %v459_v56 }
 0x208   : > { %v2980_v32 = vpop.eup %2979  ;;  %v2221_v46 = vadd.f32 %v2212_v38, %v2211_v15  ;;  %v2214_v36 = vmul.f32 %v2978_v39, %v2166_v59  ;;  %v457_v34 = vpop.xlane.xlu0 %456 }
 0x209   : > { %v2982_v60 = vpop.eup %2981  ;;  %2216 = vadd.xlane.f32.xlu1 %v2215_v44  ;;  %v2209_v48 = vmul.f32 %v2980_v32, %v3980_v20  ;;  %v506_v25 = vpop.xlane.xlu1 %505  ;;  %v466_v61 = vmul.f32 1.442695, %v460_v1  ;;  %v461_v62 = vsub.f32 0.0, %v457_v34 }
 0x20a   : > { %v2210_v5 = vmul.f32 %v2982_v60, %v3984_v11  ;;  %v2224_v23 = vadd.f32 %v2214_v36, %v2213_v45  ;;  %v516_v41 = vsub.f32 0.0, %v506_v25  ;;  %v2984_v42 = vpop.eup %2983 }
 0x20b   : > { %v468_v8 = vmul.f32 1.442695, %v461_v62  ;;  %v470_v58 = vadd.f32 1.0, %v2984_v42 }
 0x20c   : > { %v2218_v2 = vadd.f32 %v2210_v5, %v2209_v48  ;;  %v509_v47 = vpop.xlane.xlu0 %508  ;;  %v520_v20 = vmul.f32 1.442695, %v516_v41 }
 0x20d   : > { %2222 = vadd.xlane.f32.xlu1 %v2221_v46  ;;  %v512_v24 = vpop.xlane.xlu1 %511  ;;  %v517_v11 = vsub.f32 0.0, %v509_v47 }
 0x20e   : > { %2219 = vadd.xlane.f32.xlu0 %v2218_v2  ;;  %v518_v50 = vsub.f32 0.0, %v512_v24  ;;  %2985 = vpow2.f32 %v520_v20 }
 0x20f   : > { %v522_v4 = vmul.f32 1.442695, %v517_v11  ;;  %2987 = vpow2.f32 %v464_v52 }
 0x210   : > { %v515_v59 = vpop.xlane.xlu0 %514  ;;  %v524_v6 = vmul.f32 1.442695, %v518_v50  ;;  %2989 = vpow2.f32 %v466_v61 }
 0x211   : > { %v519_v28 = vsub.f32 0.0, %v515_v59 }
 0x212   : > { %2225 = vadd.xlane.f32.xlu0 %v2224_v23  ;;  %2991 = vpow2.f32 %v524_v6 }
 0x213   : > { %2993 = vpow2.f32 %v522_v4  ;;  %v526_v30 = vmul.f32 1.442695, %v519_v28 }
 0x214   : > { %2995 = vpow2.f32 %v468_v8 }
 0x215   : > { %2997 = vpow2.f32 %v526_v30 }
 0x216   : > { %2999 = vrcp.f32 %v470_v58 }
 0x218   : > { %v2986_v19 = vpop.eup %2985 }
 0x219   : > { %v2988_v21 = vpop.eup %2987  ;;  %v528_v43 = vadd.f32 1.0, %v2986_v19 }
 0x21a   : > { %v2990_v57 = vpop.eup %2989  ;;  %v471_v14 = vadd.f32 1.0, %v2988_v21 }
 0x21b   : > { %v472_v3 = vadd.f32 1.0, %v2990_v57  ;;  %3001 = vrcp.f32 %v528_v43 }
 0x21c   : > { %v2992_v63 = vpop.eup %2991  ;;  %3003 = vrcp.f32 %v471_v14 }
 0x21d   : > { %v2994_v12 = vpop.eup %2993  ;;  %v530_v16 = vadd.f32 1.0, %v2992_v63  ;;  %3005 = vrcp.f32 %v472_v3 }
 0x21e   : > { %v2996_v17 = vpop.eup %2995  ;;  %v529_v27 = vadd.f32 1.0, %v2994_v12 }
 0x21f   : > { %v2998_v29 = vpop.eup %2997  ;;  %v473_v31 = vadd.f32 1.0, %v2996_v17  ;;  %3007 = vrcp.f32 %v530_v16  ;;  %v3047_v16 = vld [vmem:[%s3145_s14] sm:$0xff] }
 0x220   : > { %3009 = vrcp.f32 %v529_v27  ;;  %v531_v33 = vadd.f32 1.0, %v2998_v29  ;;  %v3000_v7 = vpop.eup %2999  ;;  %v3048_v27 = vld [vmem:[%s3145_s14 + $0x8] sm:$0xff] }
 0x221   : > { %3011 = vrcp.f32 %v473_v31  ;;  %v3049_v31 = vld [vmem:[%s3199_s19] sm:$0xff] }
 0x222   : > { %3013 = vrcp.f32 %v531_v33 }
 0x225   : > { %v3002_v54 = vpop.eup %3001 }
 0x226   : > { %v3004_v0 = vpop.eup %3003 }
 0x227   : > { %v3006_v15 = vpop.eup %3005 }
 0x229   : > { %v3008_v39 = vpop.eup %3007 }
 0x22a   : > { %v3010_v45 = vpop.eup %3009 }
 0x22b   : > { %v3012_v10 = vpop.eup %3011 }
 0x22c   : > { %v3014_v49 = vpop.eup %3013 }
 0x296   : > { %v2217_v40 = vpop.xlane.xlu1 %2216 }
 0x297   : > { %v2227_v9 = vmul.f32 0.00390625, %v2217_v40  ;;  %v3050_v40 = vld [vmem:[%s3199_s19 + $0x8] sm:$0xff] }
 0x299   : > { %v2231_v26 = vmul.f32 %v3002_v54, %v2227_v9  ;;  %v2259_v51 = vmul.f32 %v3000_v7, %v2227_v9 }
 0x29a   : > { %v2223_v13 = vpop.xlane.xlu1 %2222 }
 0x29b   : > { %v2235_v35 = vsub.f32 0.0, %v2231_v26  ;;  %v2263_v55 = vsub.f32 0.0, %v2259_v51  ;;  %v2220_v22 = vpop.xlane.xlu0 %2219  ;;  %v2229_v38 = vmul.f32 0.00390625, %v2223_v13  ;;  %v3051_v26 = vld [vmem:[%s3145_s14 + $0x20] sm:$0xff] }
 0x29c   : > { %v2228_v44 = vmul.f32 0.00390625, %v2220_v22  ;;  %v3054_v22 = vld [vmem:[%s3145_s14 + $0x18] sm:$0xff] }
 0x29d   : > { %v2239_v32 = vmul.f32 1.442695, %v2235_v35  ;;  %v2267_v46 = vmul.f32 1.442695, %v2263_v55  ;;  %v2233_v36 = vmul.f32 %v3008_v39, %v2229_v38  ;;  %v2261_v60 = vmul.f32 %v3006_v15, %v2229_v38  ;;  %v3053_v35 = vld [vmem:[%s3145_s14 + $0x10] sm:$0xff] }
 0x29e   : > { %v2232_v48 = vmul.f32 %v3010_v45, %v2228_v44  ;;  %v2260_v5 = vmul.f32 %v3004_v0, %v2228_v44  ;;  %v3052_v0 = vld [vmem:[%s3145_s14 + $0x28] sm:$0xff]  ;;  %v3055_v44 = vld [vmem:[%s3199_s19 + $0x10] sm:$0xff] }
 0x29f   : > { %3015 = vpow2.f32 %v2239_v32  ;;  %v2237_v23 = vsub.f32 0.0, %v2233_v36  ;;  %v2265_v2 = vsub.f32 0.0, %v2261_v60  ;;  %v2226_v53 = vpop.xlane.xlu0 %2225  ;;  %v3056_v32 = vld [vmem:[%s3199_s19 + $0x18] sm:$0xff]  ;;  %v3057_v36 = vld [vmem:[%s3199_s19 + $0x20] sm:$0xff] }
 0x2a0   : > { %3017 = vpow2.f32 %v2267_v46  ;;  %v2236_v18 = vsub.f32 0.0, %v2232_v48  ;;  %v2264_v34 = vsub.f32 0.0, %v2260_v5  ;;  %v2230_v25 = vmul.f32 0.00390625, %v2226_v53  ;;  %v3058_v48 = vld [vmem:[%s3199_s19 + $0x28] sm:$0xff]  ;;  %v3059_v53 = vld [vmem:[%s3145_s14 + $0x30] sm:$0xff] }
 0x2a1   : > { %v2243_v41 = vmul.f32 1.442695, %v2237_v23  ;;  %v2271_v47 = vmul.f32 1.442695, %v2265_v2 }
 0x2a2   : > { %v2241_v24 = vmul.f32 1.442695, %v2236_v18  ;;  %v2269_v56 = vmul.f32 1.442695, %v2264_v34  ;;  %v2234_v37 = vmul.f32 %v3014_v49, %v2230_v25  ;;  %v2262_v1 = vmul.f32 %v3012_v10, %v2230_v25  ;;  %v3060_v18 = vld [vmem:[%s3145_s14 + $0x38] sm:$0xff]  ;;  %v3061_v25 = vld [vmem:[%s3199_s19 + $0x30] sm:$0xff] }
 0x2a3   : > { %3019 = vpow2.f32 %v2243_v41  ;;  %v3062_v41 = vld [vmem:[%s3199_s19 + $0x38] sm:$0xff] }
 0x2a4   : > { %3021 = vpow2.f32 %v2241_v24  ;;  %v2238_v20 = vsub.f32 0.0, %v2234_v37  ;;  %v2266_v50 = vsub.f32 0.0, %v2262_v1 }
 0x2a5   : > { %3023 = vpow2.f32 %v2269_v56 }
 0x2a6   : > { %3025 = vpow2.f32 %v2271_v47  ;;  %v2245_v11 = vmul.f32 1.442695, %v2238_v20  ;;  %v2273_v52 = vmul.f32 1.442695, %v2266_v50 }
 0x2a8   : > { %3027 = vpow2.f32 %v2245_v11 }
 0x2a9   : > { %v3016_v59 = vpop.eup %3015  ;;  %3029 = vpow2.f32 %v2273_v52 }
 0x2aa   : > { %v3018_v61 = vpop.eup %3017  ;;  %v2247_v62 = vadd.f32 1.0, %v3016_v59 }
 0x2ab   : > { %v2275_v6 = vadd.f32 1.0, %v3018_v61 }
 0x2ac   : > { %3031 = vrcp.f32 %v2247_v62 }
 0x2ad   : > { %v3020_v4 = vpop.eup %3019  ;;  %3033 = vrcp.f32 %v2275_v6 }
 0x2ae   : > { %v3022_v28 = vpop.eup %3021  ;;  %v2249_v8 = vadd.f32 1.0, %v3020_v4 }
 0x2af   : > { %v3024_v30 = vpop.eup %3023  ;;  %v2248_v42 = vadd.f32 1.0, %v3022_v28 }
 0x2b0   : > { %v3026_v19 = vpop.eup %3025  ;;  %v2276_v21 = vadd.f32 1.0, %v3024_v30  ;;  %3035 = vrcp.f32 %v2249_v8 }
 0x2b1   : > { %3037 = vrcp.f32 %v2248_v42  ;;  %v2277_v58 = vadd.f32 1.0, %v3026_v19 }
 0x2b2   : > { %v3028_v57 = vpop.eup %3027  ;;  %3039 = vrcp.f32 %v2276_v21 }
 0x2b3   : > { %v3030_v43 = vpop.eup %3029  ;;  %3041 = vrcp.f32 %v2277_v58  ;;  %v2250_v63 = vadd.f32 1.0, %v3028_v57 }
 0x2b4   : > { %v2278_v12 = vadd.f32 1.0, %v3030_v43 }
 0x2b5   : > { %3043 = vrcp.f32 %v2250_v63 }
 0x2b6   : > { %v3032_v14 = vpop.eup %3031  ;;  %3045 = vrcp.f32 %v2278_v12 }
 0x2b7   : > { %v3034_v3 = vpop.eup %3033  ;;  %v2287_v17 = vmul.f32 %v3047_v16, %v3032_v14  ;;  %v2288_v29 = vmul.f32 %v3048_v27, %v3032_v14 }
 0x2b8   : > { %v2303_v33 = vmul.f32 %v3049_v31, %v3034_v3  ;;  %v2304_v7 = vmul.f32 %v3050_v40, %v3034_v3 }
 0x2b9   : > { %2295 = vst [vmem:[%s3997_s27] sm:$0xff] %v2287_v17  ;;  %2296 = vst [vmem:[%s3997_s27 + $0x8] sm:$0xff] %v2288_v29 }
 0x2ba   : > { %v3036_v9 = vpop.eup %3035  ;;  %2311 = vst [vmem:[%s4003_s10] sm:$0xff] %v2303_v33  ;;  %2312 = vst [vmem:[%s4003_s10 + $0x8] sm:$0xff] %v2304_v7 }
 0x2bb   : > { %v3038_v54 = vpop.eup %3037  ;;  %v2291_v51 = vmul.f32 %v3051_v26, %v3036_v9  ;;  %v2292_v13 = vmul.f32 %v3052_v0, %v3036_v9 }
 0x2bc   : > { %v3040_v15 = vpop.eup %3039  ;;  %v2289_v55 = vmul.f32 %v3053_v35, %v3038_v54  ;;  %v2290_v38 = vmul.f32 %v3054_v22, %v3038_v54 }
 0x2bd   : > { %v3042_v39 = vpop.eup %3041  ;;  %v2305_v45 = vmul.f32 %v3055_v44, %v3040_v15  ;;  %v2306_v46 = vmul.f32 %v3056_v32, %v3040_v15  ;;  %2299 = vst [vmem:[%s3997_s27 + $0x20] sm:$0xff] %v2291_v51  ;;  %2300 = vst [vmem:[%s3997_s27 + $0x28] sm:$0xff] %v2292_v13 }
 0x2be   : > { %2297 = vst [vmem:[%s3997_s27 + $0x10] sm:$0xff] %v2289_v55  ;;  %2298 = vst [vmem:[%s3997_s27 + $0x18] sm:$0xff] %v2290_v38  ;;  %v2307_v60 = vmul.f32 %v3057_v36, %v3042_v39  ;;  %v2308_v5 = vmul.f32 %v3058_v48, %v3042_v39 }
 0x2bf   : > { %v3044_v23 = vpop.eup %3043  ;;  %2313 = vst [vmem:[%s4003_s10 + $0x10] sm:$0xff] %v2305_v45  ;;  %2314 = vst [vmem:[%s4003_s10 + $0x18] sm:$0xff] %v2306_v46 }
 0x2c0   : > { %v3046_v2 = vpop.eup %3045  ;;  %2315 = vst [vmem:[%s4003_s10 + $0x20] sm:$0xff] %v2307_v60  ;;  %2316 = vst [vmem:[%s4003_s10 + $0x28] sm:$0xff] %v2308_v5  ;;  %v2293_v10 = vmul.f32 %v3059_v53, %v3044_v23  ;;  %v2294_v34 = vmul.f32 %v3060_v18, %v3044_v23 }
 0x2c1   : > { %v2309_v49 = vmul.f32 %v3061_v25, %v3046_v2  ;;  %v2310_v47 = vmul.f32 %v3062_v41, %v3046_v2 }
 0x2c2   : > { %2301 = vst [vmem:[%s3997_s27 + $0x30] sm:$0xff] %v2293_v10  ;;  %2302 = vst [vmem:[%s3997_s27 + $0x38] sm:$0xff] %v2294_v34 }
 0x2c3   : > { %2317 = vst [vmem:[%s4003_s10 + $0x30] sm:$0xff] %v2309_v49  ;;  %2318 = vst [vmem:[%s4003_s10 + $0x38] sm:$0xff] %v2310_v47 }
 0x2c4 PF: > { %s20_s30 = sadd.s32 1, %s3069_s30  }
 0x2c5   : > { %p17_p4 = scmp.ge.s32.totalorder %s20_s30, 4  }
 0x2c7   :  { %19 = sbr.rel (!%p17_p4) target bundleno = 1 (0x1), region = 112 }

</bundles_post_ra>
